<compile_context>
chip_gen: v7x
topology: tpu7x:2x2x1
jax: 0.10.0
libtpu: 0.0.40
codegen_flags: <defaults>
</compile_context>

<pallas_src>
import functools
import math

import jax
import jax.numpy as jnp
from jax import lax
from jax.experimental import pallas as pl
from jax.experimental.pallas import tpu as pltpu


_VMEM_LIMIT = 32 * 1024 * 1024  # explicit scoped-VMEM cap; safe on v5e/v6e/v7x


# ---------------------------------------------------------------------------
# helpers
# ---------------------------------------------------------------------------
def _round_up(x, m):
    return ((x + m - 1) // m) * m


def _pick_tile(dim, candidates):
    """Largest candidate that evenly divides `dim`, else the full dim."""
    for c in candidates:
        if dim >= c and dim % c == 0:
            return c
    return dim


def _choose_m_tiling(M):
    """Pad M so row tiles are >=128 (or a multiple of 8 for tiny shapes)."""
    if M >= 128:
        Mp = _round_up(M, 128)
        for tm in (512, 256, 128):
            if Mp % tm == 0:
                return Mp, tm
        return Mp, 128
    Mp = _round_up(M, 8)
    return Mp, Mp


def _pad_rows(x, Mp):
    if x.shape[0] == Mp:
        return x
    return jnp.pad(x, ((0, Mp - x.shape[0]), (0, 0)))


def _pick_head_group(num_heads, head_dim):
    """Heads processed per attention grid step.

    Prefer hg*D >= 128 (lane-dense ctx writeback) while respecting the
    (8, 128) block-shape rule on the (hg, D) trailing dims of the q/k/v block
    (hg must equal NH or be a multiple of 8)."""
    for hg in range(1, num_heads + 1):
        if num_heads % hg:
            continue
        if hg * head_dim < 128:
            continue
        if hg != num_heads and hg % 8 != 0:
            continue
        return hg
    return num_heads


# ---------------------------------------------------------------------------
# 1) tiled Linear (+ optional ReLU):  out = act(x @ W + b), W already [K, N]
# ---------------------------------------------------------------------------
def _linear_kernel(x_ref, w_ref, b_ref, o_ref, acc_ref, *, activation):
    k = pl.program_id(2)

    @pl.when(k == 0)
    def _init():
        acc_ref[...] = jnp.zeros_like(acc_ref)

    # x: (tm, tk) @ w: (tk, tn)  -- no RHS transpose on the MXU path.
    acc_ref[...] += jnp.dot(x_ref[...], w_ref[...],
                            preferred_element_type=jnp.float32)

    @pl.when(k == pl.num_programs(2) - 1)
    def _finalize():
        out = acc_ref[...] + b_ref[...].astype(jnp.float32)
        if activation == "relu":
            out = jnp.maximum(out, 0.0)
        o_ref[...] = out.astype(o_ref.dtype)


def linear_pallas(x2d, w_t, bias, activation=None):
    """x2d: [M, K]; w_t: [K, N] (pre-transposed); bias: [N]  ->  [M, N]."""
    M, K = x2d.shape
    K2, N = w_t.shape
    assert K == K2, (K, K2)

    Mp, tm = _choose_m_tiling(M)
    tn = _pick_tile(N, (512, 256, 128))
    tk = _pick_tile(K, (512, 256, 128))
    xp = _pad_rows(x2d, Mp)
    grid = (Mp // tm, N // tn, K // tk)

    itemsize = jnp.dtype(x2d.dtype).itemsize
    cost = pl.CostEstimate(
        flops=2 * Mp * N * K,
        transcendentals=0,
        # includes K-loop revisits of x and w tiles
        bytes_accessed=(Mp * K * (N // tn) + K * N * (Mp // tm)
                        + Mp * N + N) * itemsize,
    )

    out = pl.pallas_call(
        functools.partial(_linear_kernel, activation=activation),
        out_shape=jax.ShapeDtypeStruct((Mp, N), x2d.dtype),
        grid_spec=pltpu.PrefetchScalarGridSpec(
            num_scalar_prefetch=0,
            grid=grid,
            in_specs=[
                pl.BlockSpec((tm, tk), lambda i, j, k: (i, k)),
                pl.BlockSpec((tk, tn), lambda i, j, k: (k, j)),
                pl.BlockSpec((1, tn), lambda i, j, k: (0, j)),
            ],
            out_specs=pl.BlockSpec((tm, tn), lambda i, j, k: (i, j)),
            scratch_shapes=[pltpu.VMEM((tm, tn), jnp.float32)],
        ),
        compiler_params=pltpu.CompilerParams(
            dimension_semantics=("parallel", "parallel", "arbitrary"),
            vmem_limit_bytes=_VMEM_LIMIT,
        ),
        cost_estimate=cost,
    )(xp, w_t, bias.reshape(1, N).astype(jnp.float32))
    return out[:M] if Mp != M else out


# ---------------------------------------------------------------------------
# 2) Linear fused with bias + residual add + LayerNorm (tn == N, full width)
# ---------------------------------------------------------------------------
def _linear_add_ln_kernel(x_ref, w_ref, b_ref, res_ref, g_ref, be_ref,
                          o_ref, acc_ref, *, eps):
    k = pl.program_id(1)

    @pl.when(k == 0)
    def _init():
        acc_ref[...] = jnp.zeros_like(acc_ref)

    acc_ref[...] += jnp.dot(x_ref[...], w_ref[...],
                            preferred_element_type=jnp.float32)

    @pl.when(k == pl.num_programs(1) - 1)
    def _finalize():
        y = (acc_ref[...] + b_ref[...].astype(jnp.float32)
             + res_ref[...].astype(jnp.float32))
        u = jnp.mean(y, axis=-1, keepdims=True)
        yc = y - u
        var = jnp.mean(yc * yc, axis=-1, keepdims=True)
        z = yc * lax.rsqrt(var + eps)
        o_ref[...] = (z * g_ref[...].astype(jnp.float32)
                      + be_ref[...].astype(jnp.float32)).astype(o_ref.dtype)


def linear_add_layernorm_pallas(x2d, w_t, bias, res2d, gamma, beta, eps=1e-12):
    """LayerNorm(x2d @ w_t + bias + res2d).  w_t: [K, N]; res2d: [M, N]."""
    M, K = x2d.shape
    K2, N = w_t.shape
    assert K == K2 and res2d.shape == (M, N)

    Mp, tm = _choose_m_tiling(M)
    tk = _pick_tile(K, (512, 256, 128))
    xp = _pad_rows(x2d, Mp)
    rp = _pad_rows(res2d, Mp)
    grid = (Mp // tm, K // tk)

    itemsize = jnp.dtype(x2d.dtype).itemsize
    cost = pl.CostEstimate(
        flops=2 * Mp * N * K + 8 * Mp * N,
        transcendentals=Mp,
        bytes_accessed=(Mp * K + K * N * (Mp // tm) + 2 * Mp * N
                        + 3 * N) * itemsize,
    )

    out = pl.pallas_call(
        functools.partial(_linear_add_ln_kernel, eps=eps),
        out_shape=jax.ShapeDtypeStruct((Mp, N), x2d.dtype),
        grid_spec=pltpu.PrefetchScalarGridSpec(
            num_scalar_prefetch=0,
            grid=grid,
            in_specs=[
                pl.BlockSpec((tm, tk), lambda i, k: (i, k)),
                pl.BlockSpec((tk, N), lambda i, k: (k, 0)),
                pl.BlockSpec((1, N), lambda i, k: (0, 0)),
                pl.BlockSpec((tm, N), lambda i, k: (i, 0)),   # residual
                pl.BlockSpec((1, N), lambda i, k: (0, 0)),    # gamma
                pl.BlockSpec((1, N), lambda i, k: (0, 0)),    # beta
            ],
            out_specs=pl.BlockSpec((tm, N), lambda i, k: (i, 0)),
            scratch_shapes=[pltpu.VMEM((tm, N), jnp.float32)],
        ),
        compiler_params=pltpu.CompilerParams(
            dimension_semantics=("parallel", "arbitrary"),
            vmem_limit_bytes=_VMEM_LIMIT,
        ),
        cost_estimate=cost,
    )(xp, w_t, bias.reshape(1, N).astype(jnp.float32), rp,
      gamma.reshape(1, N).astype(jnp.float32),
      beta.reshape(1, N).astype(jnp.float32))
    return out[:M] if Mp != M else out


# ---------------------------------------------------------------------------
# 3) multi-head softmax attention, one (batch, head-group) tile per grid step
#    q/k/v read directly from the (B, S, 3, NH, D) fused-QKV output;
#    ctx written directly into (B, S, H)  ->  no host-side head transposes.
# ---------------------------------------------------------------------------
def _attention_kernel(q_ref, k_ref, v_ref, m_ref, o_ref, *, scale, hg,
                      head_dim, compute_dtype, approx_recip):
    mask = m_ref[...].astype(jnp.float32)                        # (1, S)
    for h in range(hg):                                          # unrolled
        # scale folded into q: O(S*D) multiplies instead of O(S^2)
        q = (q_ref[:, h, :].astype(jnp.float32) * scale).astype(compute_dtype)
        k = k_ref[:, h, :].astype(compute_dtype)
        v = v_ref[:, h, :].astype(compute_dtype)
        s = lax.dot_general(q, k, (((1,), (1,)), ((), ())),
                            preferred_element_type=jnp.float32)  # (S, S)
        s = s + mask                                             # broadcast q-axis
        s_max = jnp.max(s, axis=-1, keepdims=True)
        p = jnp.exp(s - s_max)
        denom = jnp.sum(p, axis=-1, keepdims=True)               # (S, 1)
        ctx = jnp.dot(p.astype(compute_dtype), v,
                      preferred_element_type=jnp.float32)        # (S, D)
        ctx = ctx * pl.reciprocal(denom, approx=approx_recip)
        o_ref[:, h * head_dim:(h + 1) * head_dim] = ctx.astype(o_ref.dtype)


def attention_pallas(qkv, mask, *, scale, compute_dtype):
    """qkv: [B, S, 3, NH, D]; mask: additive [B, 1, 1, S]  ->  [B, S, NH*D]."""
    B, S, three, NH, D = qkv.shape
    assert three == 3
    H = NH * D
    hg = _pick_head_group(NH, D)
    approx = jnp.dtype(compute_dtype) == jnp.dtype(jnp.bfloat16)

    def qkv_spec(slot):
        return pl.BlockSpec((None, S, None, hg, D),
                            lambda b, g, s=slot: (b, 0, s, g, 0))

    return pl.pallas_call(
        functools.partial(_attention_kernel, scale=scale, hg=hg, head_dim=D,
                          compute_dtype=compute_dtype, approx_recip=approx),
        out_shape=jax.ShapeDtypeStruct((B, S, H), qkv.dtype),
        grid_spec=pltpu.PrefetchScalarGridSpec(
            num_scalar_prefetch=0,
            grid=(B, NH // hg),
            in_specs=[
                qkv_spec(0), qkv_spec(1), qkv_spec(2),
                pl.BlockSpec((None, None, 1, S), lambda b, g: (b, 0, 0, 0)),
            ],
            out_specs=pl.BlockSpec((None, S, hg * D), lambda b, g: (b, 0, g)),
        ),
        compiler_params=pltpu.CompilerParams(
            dimension_semantics=("parallel", "parallel"),
            vmem_limit_bytes=_VMEM_LIMIT,
        ),
    )(qkv, qkv, qkv, mask)


# ---------------------------------------------------------------------------
# full Encoder forward
# ---------------------------------------------------------------------------
def encoder_forward(hidden_states, attention_mask, params, *, num_heads,
                    compute_dtype=jnp.float32):
    """hidden_states: [B, S, H]; attention_mask: additive, broadcastable to
    [B, 1, 1, S] (BERT style).  compute_dtype=bf16 runs the MXU in bf16 with
    f32 accumulation / f32 LayerNorm math."""
    B, S, H = hidden_states.shape
    D = H // num_heads
    M = B * S
    cd = jnp.dtype(compute_dtype)

    x2d = hidden_states.reshape(M, H).astype(cd)

    # --- fused QKV projection (single x read, weights pre-transposed [K, N]) ---
    wqkv_t = jnp.concatenate(
        [params["wq"], params["wk"], params["wv"]], axis=0).T.astype(cd)
    bqkv = jnp.concatenate([params["bq"], params["bk"], params["bv"]], axis=0)
    qkv = linear_pallas(x2d, wqkv_t, bqkv)                 # [M, 3H]
    qkv5 = qkv.reshape(B, S, 3, num_heads, D)              # free reshape

    # --- attention (mask kept at [B, 1, 1, S]) ---
    mask = jnp.broadcast_to(attention_mask, (B, 1, 1, S)).astype(jnp.float32)
    ctx2d = attention_pallas(qkv5, mask, scale=1.0 / math.sqrt(D),
                             compute_dtype=cd).reshape(M, H)

    # --- SelfOutput: dense + dropout(identity) + add&LN, fused epilogue ---
    attn_out = linear_add_layernorm_pallas(
        ctx2d, params["w_attn_out"].T.astype(cd), params["b_attn_out"],
        x2d, params["ln1_gamma"], params["ln1_beta"])

    # --- Intermediate: dense + ReLU ---
    inter = linear_pallas(attn_out, params["w_inter"].T.astype(cd),
                          params["b_inter"], activation="relu")

    # --- Output: dense + dropout(identity) + add&LN, fused epilogue ---
    layer_out = linear_add_layernorm_pallas(
        inter, params["w_out"].T.astype(cd), params["b_out"],
        attn_out, params["ln2_gamma"], params["ln2_beta"])

    return layer_out.reshape(B, S, H).astype(hidden_states.dtype)


# ---------------------------------------------------------------------------
# pure-JAX reference (mirrors the PyTorch module in eval mode)
# ---------------------------------------------------------------------------
def encoder_ref(hidden_states, attention_mask, params, num_heads):
    B, S, H = hidden_states.shape
    D = H // num_heads

    def linear(x, w, b):
        return jnp.einsum("...k,nk->...n", x, w) + b

    def layernorm(x, g, b, eps=1e-12):
        u = x.mean(-1, keepdims=True)
        s = ((x - u) ** 2).mean(-1, keepdims=True)
        return g * (x - u) / jnp.sqrt(s + eps) + b

    def split_heads(x):
        return x.reshape(B, S, num_heads, D).transpose(0, 2, 1, 3)

    q = split_heads(linear(hidden_states, params["wq"], params["bq"]))
    k = split_heads(linear(hidden_states, params["wk"], params["bk"]))
    v = split_heads(linear(hidden_states, params["wv"], params["bv"]))

    scores = jnp.einsum("bhqd,bhkd->bhqk", q, k) / math.sqrt(D)
    scores = scores + attention_mask
    probs = jax.nn.softmax(scores, axis=-1)
    ctx = jnp.einsum("bhqk,bhkd->bhqd", probs, v)
    ctx = ctx.transpose(0, 2, 1, 3).reshape(B, S, H)

    so = linear(ctx, params["w_attn_out"], params["b_attn_out"])
    attn_out = layernorm(so + hidden_states,
                         params["ln1_gamma"], params["ln1_beta"])
    inter = jax.nn.relu(linear(attn_out, params["w_inter"], params["b_inter"]))
    out = linear(inter, params["w_out"], params["b_out"])
    return layernorm(out + attn_out, params["ln2_gamma"], params["ln2_beta"])


if __name__ == "__main__":
    batch, seq, hidden_size = 2, 8, 32
    num_heads = 4
    intermediate_size = 64

    keys = jax.random.split(jax.random.PRNGKey(0), 13)

    def init_linear(kw, kb, out_f, in_f):
        bound = 1.0 / math.sqrt(in_f)
        w = jax.random.uniform(kw, (out_f, in_f), minval=-bound, maxval=bound,
                               dtype=jnp.float32)
        b = jax.random.uniform(kb, (out_f,), minval=-bound, maxval=bound,
                               dtype=jnp.float32)
        return w, b

    wq, bq = init_linear(keys[0], keys[1], hidden_size, hidden_size)
    wk, bk = init_linear(keys[2], keys[3], hidden_size, hidden_size)
    wv, bv = init_linear(keys[4], keys[5], hidden_size, hidden_size)
    w_ao, b_ao = init_linear(keys[6], keys[7], hidden_size, hidden_size)
    w_in, b_in = init_linear(keys[8], keys[9], intermediate_size, hidden_size)
    w_ot, b_ot = init_linear(keys[10], keys[11], hidden_size, intermediate_size)

    params = {
        "wq": wq, "bq": bq, "wk": wk, "bk": bk, "wv": wv, "bv": bv,
        "w_attn_out": w_ao, "b_attn_out": b_ao,
        "ln1_gamma": jnp.ones((hidden_size,), jnp.float32),
        "ln1_beta": jnp.zeros((hidden_size,), jnp.float32),
        "w_inter": w_in, "b_inter": b_in,
        "w_out": w_ot, "b_out": b_ot,
        "ln2_gamma": jnp.ones((hidden_size,), jnp.float32),
        "ln2_beta": jnp.zeros((hidden_size,), jnp.float32),
    }

    hidden_states = jax.random.normal(keys[12], (batch, seq, hidden_size),
                                      dtype=jnp.float32)
    # Additive BERT-style attention mask [B, 1, 1, S]: 0 = attend, -1e4 = masked.
    lengths = jnp.array([seq, seq - 3], dtype=jnp.int32)
    valid = jnp.arange(seq)[None, :] < lengths[:, None]           # [B, S]
    attention_mask = jnp.where(valid, 0.0, -10000.0).astype(
        jnp.float32)[:, None, None, :]

    encoder_jit = jax.jit(encoder_forward,
                          static_argnames=("num_heads", "compute_dtype"))
    ref = encoder_ref(hidden_states, attention_mask, params, num_heads)

    # f32 compute path: strict correctness check.
    out_f32 = jax.block_until_ready(
        encoder_jit(hidden_states, attention_mask, params,
                    num_heads=num_heads, compute_dtype=jnp.float32))
    assert out_f32.shape == (batch, seq, hidden_size)
    assert jnp.allclose(out_f32, ref, atol=1e-3, rtol=1e-3), float(
        jnp.max(jnp.abs(out_f32 - ref)))

    # bf16 compute path (MXU-friendly): loose sanity check.
    out_bf16 = jax.block_until_ready(
        encoder_jit(hidden_states, attention_mask, params,
                    num_heads=num_heads, compute_dtype=jnp.bfloat16))
    assert out_bf16.shape == (batch, seq, hidden_size)
    assert bool(jnp.all(jnp.isfinite(out_bf16)))
    assert float(jnp.max(jnp.abs(out_bf16 - ref))) < 0.15

    print("KERNEL_OK")
</pallas_src>

<mosaic_0001>
module attributes {stable_mosaic.version = 11 : i64} {
  func.func @_linear_kernel(%arg0: i32, %arg1: i32, %arg2: i32, %arg3: memref<16x32xf32, #tpu.memory_space<vmem>>, %arg4: memref<32x96xf32, #tpu.memory_space<vmem>>, %arg5: memref<1x96xf32, #tpu.memory_space<vmem>>, %arg6: memref<16x96xf32, #tpu.memory_space<vmem>>, %arg7: memref<16x96xf32, #tpu.memory_space<vmem>>) attributes {dimension_semantics = [#tpu.dimension_semantics<parallel>, #tpu.dimension_semantics<parallel>, #tpu.dimension_semantics<arbitrary>], iteration_bounds = array<i64: 1, 1, 1>, scalar_prefetch = 0 : i64, scratch_operands = 1 : i64, tpu.core_type = #tpu.core_type<tc>, window_params = [{transform_indices = @transform_0, window_bounds = array<i64: 16, 32>}, {transform_indices = @transform_1, window_bounds = array<i64: 32, 96>}, {transform_indices = @transform_2, window_bounds = array<i64: 1, 96>}, {transform_indices = @transform_3, window_bounds = array<i64: 16, 96>}]} {
    %c0_i32 = arith.constant 0 : i32
    %0 = arith.cmpi eq, %arg2, %c0_i32 : i32
    %1 = arith.extui %0 : i1 to i32
    %c0_i32_0 = arith.constant 0 : i32
    %2 = arith.cmpi ne, %1, %c0_i32_0 : i32
    scf.if %2 {
      %cst_10 = arith.constant 0.000000e+00 : f32
      %12 = vector.broadcast %cst_10 : f32 to vector<16x96xf32>
      %c0_11 = arith.constant 0 : index
      %c0_12 = arith.constant 0 : index
      %13 = vector.load %arg7[%c0_11, %c0_12] : memref<16x96xf32, #tpu.memory_space<vmem>>, vector<16x96xf32>
      tpu.vector_store %arg7[%c0_11, %c0_12], %12 {strides = array<i32>} : memref<16x96xf32, #tpu.memory_space<vmem>>, vector<16x96xf32>,
    } else {
    }
    %c0 = arith.constant 0 : index
    %c0_1 = arith.constant 0 : index
    %3 = vector.load %arg7[%c0, %c0_1] : memref<16x96xf32, #tpu.memory_space<vmem>>, vector<16x96xf32>
    %c0_2 = arith.constant 0 : index
    %c0_3 = arith.constant 0 : index
    %4 = vector.load %arg3[%c0_2, %c0_3] : memref<16x32xf32, #tpu.memory_space<vmem>>, vector<16x32xf32>
    %c0_4 = arith.constant 0 : index
    %c0_5 = arith.constant 0 : index
    %5 = vector.load %arg4[%c0_4, %c0_5] : memref<32x96xf32, #tpu.memory_space<vmem>>, vector<32x96xf32>
    %cst = arith.constant dense<0.000000e+00> : vector<16x96xf32>
    %6 = tpu.matmul %4, %5, %cst {dimension_numbers = #tpu.dot_dimension_numbers<[1], [0], [0], [1], [0, 0, 1, 1], [], []>} : vector<16x32xf32>, vector<32x96xf32>, vector<16x96xf32> -> vector<16x96xf32>
    %7 = arith.addf %3, %6 : vector<16x96xf32>
    %c0_6 = arith.constant 0 : index
    %c0_7 = arith.constant 0 : index
    %8 = vector.load %arg7[%c0_6, %c0_7] : memref<16x96xf32, #tpu.memory_space<vmem>>, vector<16x96xf32>
    tpu.vector_store %arg7[%c0_6, %c0_7], %7 {strides = array<i32>} : memref<16x96xf32, #tpu.memory_space<vmem>>, vector<16x96xf32>,
    %c0_i32_8 = arith.constant 0 : i32
    %9 = arith.cmpi eq, %arg2, %c0_i32_8 : i32
    %10 = arith.extui %9 : i1 to i32
    %c0_i32_9 = arith.constant 0 : i32
    %11 = arith.cmpi ne, %10, %c0_i32_9 : i32
    scf.if %11 {
      %c0_10 = arith.constant 0 : index
      %c0_11 = arith.constant 0 : index
      %12 = vector.load %arg7[%c0_10, %c0_11] : memref<16x96xf32, #tpu.memory_space<vmem>>, vector<16x96xf32>
      %c0_12 = arith.constant 0 : index
      %c0_13 = arith.constant 0 : index
      %13 = vector.load %arg5[%c0_12, %c0_13] : memref<1x96xf32, #tpu.memory_space<vmem>>, vector<1x96xf32>
      %14 = vector.broadcast %13 : vector<1x96xf32> to vector<16x96xf32>
      %15 = arith.addf %12, %14 : vector<16x96xf32>
      %c0_14 = arith.constant 0 : index
      %c0_15 = arith.constant 0 : index
      %16 = vector.load %arg6[%c0_14, %c0_15] : memref<16x96xf32, #tpu.memory_space<vmem>>, vector<16x96xf32>
      tpu.vector_store %arg6[%c0_14, %c0_15], %15 {strides = array<i32>} : memref<16x96xf32, #tpu.memory_space<vmem>>, vector<16x96xf32>,
    } else {
    }
    return
  }
  func.func @transform_0(%arg0: i32, %arg1: i32, %arg2: i32) -> (i32, i32) {
    %c0_i32 = arith.constant 0 : i32
    return %arg0, %arg2 : i32, i32
  }
  func.func @transform_1(%arg0: i32, %arg1: i32, %arg2: i32) -> (i32, i32) {
    %c0_i32 = arith.constant 0 : i32
    return %arg2, %arg1 : i32, i32
  }
  func.func @transform_2(%arg0: i32, %arg1: i32, %arg2: i32) -> (i32, i32) {
    %c0_i32 = arith.constant 0 : i32
    %c0_i32_0 = arith.constant 0 : i32
    return %c0_i32, %arg1 : i32, i32
  }
  func.func @transform_3(%arg0: i32, %arg1: i32, %arg2: i32) -> (i32, i32) {
    %c0_i32 = arith.constant 0 : i32
    return %arg0, %arg1 : i32, i32
  }
}

module attributes {stable_mosaic.version = 11 : i64} {
  func.func @_attention_kernel(%arg0: i32, %arg1: i32, %arg2: memref<1x8x1x4x8xf32, #tpu.memory_space<vmem>>, %arg3: memref<1x8x1x4x8xf32, #tpu.memory_space<vmem>>, %arg4: memref<1x8x1x4x8xf32, #tpu.memory_space<vmem>>, %arg5: memref<1x1x1x8xf32, #tpu.memory_space<vmem>>, %arg6: memref<1x8x32xf32, #tpu.memory_space<vmem>>) attributes {dimension_semantics = [#tpu.dimension_semantics<parallel>, #tpu.dimension_semantics<parallel>], iteration_bounds = array<i64: 2, 1>, scalar_prefetch = 0 : i64, scratch_operands = 0 : i64, tpu.core_type = #tpu.core_type<tc>, window_params = [{transform_indices = @transform_0, window_bounds = array<i64: 1, 8, 1, 4, 8>}, {transform_indices = @transform_1, window_bounds = array<i64: 1, 8, 1, 4, 8>}, {transform_indices = @transform_2, window_bounds = array<i64: 1, 8, 1, 4, 8>}, {transform_indices = @transform_3, window_bounds = array<i64: 1, 1, 1, 8>}, {transform_indices = @transform_4, window_bounds = array<i64: 1, 8, 32>}]} {
    %c0 = arith.constant 0 : index
    %c0_0 = arith.constant 0 : index
    %c0_1 = arith.constant 0 : index
    %c0_2 = arith.constant 0 : index
    %0 = vector.load %arg5[%c0, %c0_0, %c0_1, %c0_2] : memref<1x1x1x8xf32, #tpu.memory_space<vmem>>, vector<1x1x1x8xf32>
    %1 = vector.shape_cast %0 : vector<1x1x1x8xf32> to vector<1x8xf32>
    %c0_3 = arith.constant 0 : index
    %c0_4 = arith.constant 0 : index
    %c0_5 = arith.constant 0 : index
    %c0_6 = arith.constant 0 : index
    %c0_7 = arith.constant 0 : index
    %2 = vector.load %arg2[%c0_3, %c0_4, %c0_5, %c0_6, %c0_7] : memref<1x8x1x4x8xf32, #tpu.memory_space<vmem>>, vector<1x8x1x1x8xf32>
    %3 = vector.shape_cast %2 : vector<1x8x1x1x8xf32> to vector<8x8xf32>
    %cst = arith.constant 0.353553385 : f32
    %4 = vector.broadcast %cst : f32 to vector<8x8xf32>
    %5 = arith.mulf %3, %4 : vector<8x8xf32>
    %c0_8 = arith.constant 0 : index
    %c0_9 = arith.constant 0 : index
    %c0_10 = arith.constant 0 : index
    %c0_11 = arith.constant 0 : index
    %c0_12 = arith.constant 0 : index
    %6 = vector.load %arg3[%c0_8, %c0_9, %c0_10, %c0_11, %c0_12] : memref<1x8x1x4x8xf32, #tpu.memory_space<vmem>>, vector<1x8x1x1x8xf32>
    %7 = vector.shape_cast %6 : vector<1x8x1x1x8xf32> to vector<8x8xf32>
    %c0_13 = arith.constant 0 : index
    %c0_14 = arith.constant 0 : index
    %c0_15 = arith.constant 0 : index
    %c0_16 = arith.constant 0 : index
    %c0_17 = arith.constant 0 : index
    %8 = vector.load %arg4[%c0_13, %c0_14, %c0_15, %c0_16, %c0_17] : memref<1x8x1x4x8xf32, #tpu.memory_space<vmem>>, vector<1x8x1x1x8xf32>
    %9 = vector.shape_cast %8 : vector<1x8x1x1x8xf32> to vector<8x8xf32>
    %cst_18 = arith.constant dense<0.000000e+00> : vector<8x8xf32>
    %10 = tpu.matmul %5, %7, %cst_18 {dimension_numbers = #tpu.dot_dimension_numbers<[1], [1], [0], [0], [0, 0, 1, 0], [], []>} : vector<8x8xf32>, vector<8x8xf32>, vector<8x8xf32> -> vector<8x8xf32>
    %11 = vector.broadcast %1 : vector<1x8xf32> to vector<8x8xf32>
    %12 = arith.addf %10, %11 : vector<8x8xf32>
    %cst_19 = arith.constant dense<0xFF800000> : vector<8xf32>
    %13 = vector.multi_reduction <maximumf>, %12, %cst_19 [1] : vector<8x8xf32> to vector<8xf32>
    %14 = vector.shape_cast %13 : vector<8xf32> to vector<8x1xf32>
    %15 = vector.broadcast %14 : vector<8x1xf32> to vector<8x8xf32>
    %16 = arith.subf %12, %15 : vector<8x8xf32>
    %17 = math.exp %16 : vector<8x8xf32>
    %cst_20 = arith.constant dense<0.000000e+00> : vector<8xf32>
    %18 = vector.multi_reduction <add>, %17, %cst_20 [1] : vector<8x8xf32> to vector<8xf32>
    %19 = vector.shape_cast %18 : vector<8xf32> to vector<8x1xf32>
    %cst_21 = arith.constant dense<0.000000e+00> : vector<8x8xf32>
    %20 = tpu.matmul %17, %9, %cst_21 {dimension_numbers = #tpu.dot_dimension_numbers<[1], [0], [0], [1], [0, 0, 1, 1], [], []>} : vector<8x8xf32>, vector<8x8xf32>, vector<8x8xf32> -> vector<8x8xf32>
    %21 = tpu.reciprocal %19 : vector<8x1xf32> -> vector<8x1xf32>
    %22 = vector.broadcast %21 : vector<8x1xf32> to vector<8x8xf32>
    %23 = arith.mulf %20, %22 : vector<8x8xf32>
    %c0_22 = arith.constant 0 : index
    %c0_23 = arith.constant 0 : index
    %c0_24 = arith.constant 0 : index
    %24 = vector.load %arg6[%c0_22, %c0_23, %c0_24] : memref<1x8x32xf32, #tpu.memory_space<vmem>>, vector<1x8x8xf32>
    %25 = vector.shape_cast %24 : vector<1x8x8xf32> to vector<8x8xf32>
    %26 = vector.shape_cast %23 : vector<8x8xf32> to vector<1x8x8xf32>
    tpu.vector_store %arg6[%c0_22, %c0_23, %c0_24], %26 {strides = array<i32>} : memref<1x8x32xf32, #tpu.memory_space<vmem>>, vector<1x8x8xf32>,
    %c0_25 = arith.constant 0 : index
    %c0_26 = arith.constant 0 : index
    %c0_27 = arith.constant 0 : index
    %c1 = arith.constant 1 : index
    %c0_28 = arith.constant 0 : index
    %27 = vector.load %arg2[%c0_25, %c0_26, %c0_27, %c1, %c0_28] : memref<1x8x1x4x8xf32, #tpu.memory_space<vmem>>, vector<1x8x1x1x8xf32>
    %28 = vector.shape_cast %27 : vector<1x8x1x1x8xf32> to vector<8x8xf32>
    %cst_29 = arith.constant 0.353553385 : f32
    %29 = vector.broadcast %cst_29 : f32 to vector<8x8xf32>
    %30 = arith.mulf %28, %29 : vector<8x8xf32>
    %c0_30 = arith.constant 0 : index
    %c0_31 = arith.constant 0 : index
    %c0_32 = arith.constant 0 : index
    %c1_33 = arith.constant 1 : index
    %c0_34 = arith.constant 0 : index
    %31 = vector.load %arg3[%c0_30, %c0_31, %c0_32, %c1_33, %c0_34] : memref<1x8x1x4x8xf32, #tpu.memory_space<vmem>>, vector<1x8x1x1x8xf32>
    %32 = vector.shape_cast %31 : vector<1x8x1x1x8xf32> to vector<8x8xf32>
    %c0_35 = arith.constant 0 : index
    %c0_36 = arith.constant 0 : index
    %c0_37 = arith.constant 0 : index
    %c1_38 = arith.constant 1 : index
    %c0_39 = arith.constant 0 : index
    %33 = vector.load %arg4[%c0_35, %c0_36, %c0_37, %c1_38, %c0_39] : memref<1x8x1x4x8xf32, #tpu.memory_space<vmem>>, vector<1x8x1x1x8xf32>
    %34 = vector.shape_cast %33 : vector<1x8x1x1x8xf32> to vector<8x8xf32>
    %cst_40 = arith.constant dense<0.000000e+00> : vector<8x8xf32>
    %35 = tpu.matmul %30, %32, %cst_40 {dimension_numbers = #tpu.dot_dimension_numbers<[1], [1], [0], [0], [0, 0, 1, 0], [], []>} : vector<8x8xf32>, vector<8x8xf32>, vector<8x8xf32> -> vector<8x8xf32>
    %36 = vector.broadcast %1 : vector<1x8xf32> to vector<8x8xf32>
    %37 = arith.addf %35, %36 : vector<8x8xf32>
    %cst_41 = arith.constant dense<0xFF800000> : vector<8xf32>
    %38 = vector.multi_reduction <maximumf>, %37, %cst_41 [1] : vector<8x8xf32> to vector<8xf32>
    %39 = vector.shape_cast %38 : vector<8xf32> to vector<8x1xf32>
    %40 = vector.broadcast %39 : vector<8x1xf32> to vector<8x8xf32>
    %41 = arith.subf %37, %40 : vector<8x8xf32>
    %42 = math.exp %41 : vector<8x8xf32>
    %cst_42 = arith.constant dense<0.000000e+00> : vector<8xf32>
    %43 = vector.multi_reduction <add>, %42, %cst_42 [1] : vector<8x8xf32> to vector<8xf32>
    %44 = vector.shape_cast %43 : vector<8xf32> to vector<8x1xf32>
    %cst_43 = arith.constant dense<0.000000e+00> : vector<8x8xf32>
    %45 = tpu.matmul %42, %34, %cst_43 {dimension_numbers = #tpu.dot_dimension_numbers<[1], [0], [0], [1], [0, 0, 1, 1], [], []>} : vector<8x8xf32>, vector<8x8xf32>, vector<8x8xf32> -> vector<8x8xf32>
    %46 = tpu.reciprocal %44 : vector<8x1xf32> -> vector<8x1xf32>
    %47 = vector.broadcast %46 : vector<8x1xf32> to vector<8x8xf32>
    %48 = arith.mulf %45, %47 : vector<8x8xf32>
    %c0_44 = arith.constant 0 : index
    %c0_45 = arith.constant 0 : index
    %c8 = arith.constant 8 : index
    %49 = vector.load %arg6[%c0_44, %c0_45, %c8] : memref<1x8x32xf32, #tpu.memory_space<vmem>>, vector<1x8x8xf32>
    %50 = vector.shape_cast %49 : vector<1x8x8xf32> to vector<8x8xf32>
    %51 = vector.shape_cast %48 : vector<8x8xf32> to vector<1x8x8xf32>
    tpu.vector_store %arg6[%c0_44, %c0_45, %c8], %51 {strides = array<i32>} : memref<1x8x32xf32, #tpu.memory_space<vmem>>, vector<1x8x8xf32>,
    %c0_46 = arith.constant 0 : index
    %c0_47 = arith.constant 0 : index
    %c0_48 = arith.constant 0 : index
    %c2 = arith.constant 2 : index
    %c0_49 = arith.constant 0 : index
    %52 = vector.load %arg2[%c0_46, %c0_47, %c0_48, %c2, %c0_49] : memref<1x8x1x4x8xf32, #tpu.memory_space<vmem>>, vector<1x8x1x1x8xf32>
    %53 = vector.shape_cast %52 : vector<1x8x1x1x8xf32> to vector<8x8xf32>
    %cst_50 = arith.constant 0.353553385 : f32
    %54 = vector.broadcast %cst_50 : f32 to vector<8x8xf32>
    %55 = arith.mulf %53, %54 : vector<8x8xf32>
    %c0_51 = arith.constant 0 : index
    %c0_52 = arith.constant 0 : index
    %c0_53 = arith.constant 0 : index
    %c2_54 = arith.constant 2 : index
    %c0_55 = arith.constant 0 : index
    %56 = vector.load %arg3[%c0_51, %c0_52, %c0_53, %c2_54, %c0_55] : memref<1x8x1x4x8xf32, #tpu.memory_space<vmem>>, vector<1x8x1x1x8xf32>
    %57 = vector.shape_cast %56 : vector<1x8x1x1x8xf32> to vector<8x8xf32>
    %c0_56 = arith.constant 0 : index
    %c0_57 = arith.constant 0 : index
    %c0_58 = arith.constant 0 : index
    %c2_59 = arith.constant 2 : index
    %c0_60 = arith.constant 0 : index
    %58 = vector.load %arg4[%c0_56, %c0_57, %c0_58, %c2_59, %c0_60] : memref<1x8x1x4x8xf32, #tpu.memory_space<vmem>>, vector<1x8x1x1x8xf32>
    %59 = vector.shape_cast %58 : vector<1x8x1x1x8xf32> to vector<8x8xf32>
    %cst_61 = arith.constant dense<0.000000e+00> : vector<8x8xf32>
    %60 = tpu.matmul %55, %57, %cst_61 {dimension_numbers = #tpu.dot_dimension_numbers<[1], [1], [0], [0], [0, 0, 1, 0], [], []>} : vector<8x8xf32>, vector<8x8xf32>, vector<8x8xf32> -> vector<8x8xf32>
    %61 = vector.broadcast %1 : vector<1x8xf32> to vector<8x8xf32>
    %62 = arith.addf %60, %61 : vector<8x8xf32>
    %cst_62 = arith.constant dense<0xFF800000> : vector<8xf32>
    %63 = vector.multi_reduction <maximumf>, %62, %cst_62 [1] : vector<8x8xf32> to vector<8xf32>
    %64 = vector.shape_cast %63 : vector<8xf32> to vector<8x1xf32>
    %65 = vector.broadcast %64 : vector<8x1xf32> to vector<8x8xf32>
    %66 = arith.subf %62, %65 : vector<8x8xf32>
    %67 = math.exp %66 : vector<8x8xf32>
    %cst_63 = arith.constant dense<0.000000e+00> : vector<8xf32>
    %68 = vector.multi_reduction <add>, %67, %cst_63 [1] : vector<8x8xf32> to vector<8xf32>
    %69 = vector.shape_cast %68 : vector<8xf32> to vector<8x1xf32>
    %cst_64 = arith.constant dense<0.000000e+00> : vector<8x8xf32>
    %70 = tpu.matmul %67, %59, %cst_64 {dimension_numbers = #tpu.dot_dimension_numbers<[1], [0], [0], [1], [0, 0, 1, 1], [], []>} : vector<8x8xf32>, vector<8x8xf32>, vector<8x8xf32> -> vector<8x8xf32>
    %71 = tpu.reciprocal %69 : vector<8x1xf32> -> vector<8x1xf32>
    %72 = vector.broadcast %71 : vector<8x1xf32> to vector<8x8xf32>
    %73 = arith.mulf %70, %72 : vector<8x8xf32>
    %c0_65 = arith.constant 0 : index
    %c0_66 = arith.constant 0 : index
    %c16 = arith.constant 16 : index
    %74 = vector.load %arg6[%c0_65, %c0_66, %c16] : memref<1x8x32xf32, #tpu.memory_space<vmem>>, vector<1x8x8xf32>
    %75 = vector.shape_cast %74 : vector<1x8x8xf32> to vector<8x8xf32>
    %76 = vector.shape_cast %73 : vector<8x8xf32> to vector<1x8x8xf32>
    tpu.vector_store %arg6[%c0_65, %c0_66, %c16], %76 {strides = array<i32>} : memref<1x8x32xf32, #tpu.memory_space<vmem>>, vector<1x8x8xf32>,
    %c0_67 = arith.constant 0 : index
    %c0_68 = arith.constant 0 : index
    %c0_69 = arith.constant 0 : index
    %c3 = arith.constant 3 : index
    %c0_70 = arith.constant 0 : index
    %77 = vector.load %arg2[%c0_67, %c0_68, %c0_69, %c3, %c0_70] : memref<1x8x1x4x8xf32, #tpu.memory_space<vmem>>, vector<1x8x1x1x8xf32>
    %78 = vector.shape_cast %77 : vector<1x8x1x1x8xf32> to vector<8x8xf32>
    %cst_71 = arith.constant 0.353553385 : f32
    %79 = vector.broadcast %cst_71 : f32 to vector<8x8xf32>
    %80 = arith.mulf %78, %79 : vector<8x8xf32>
    %c0_72 = arith.constant 0 : index
    %c0_73 = arith.constant 0 : index
    %c0_74 = arith.constant 0 : index
    %c3_75 = arith.constant 3 : index
    %c0_76 = arith.constant 0 : index
    %81 = vector.load %arg3[%c0_72, %c0_73, %c0_74, %c3_75, %c0_76] : memref<1x8x1x4x8xf32, #tpu.memory_space<vmem>>, vector<1x8x1x1x8xf32>
    %82 = vector.shape_cast %81 : vector<1x8x1x1x8xf32> to vector<8x8xf32>
    %c0_77 = arith.constant 0 : index
    %c0_78 = arith.constant 0 : index
    %c0_79 = arith.constant 0 : index
    %c3_80 = arith.constant 3 : index
    %c0_81 = arith.constant 0 : index
    %83 = vector.load %arg4[%c0_77, %c0_78, %c0_79, %c3_80, %c0_81] : memref<1x8x1x4x8xf32, #tpu.memory_space<vmem>>, vector<1x8x1x1x8xf32>
    %84 = vector.shape_cast %83 : vector<1x8x1x1x8xf32> to vector<8x8xf32>
    %cst_82 = arith.constant dense<0.000000e+00> : vector<8x8xf32>
    %85 = tpu.matmul %80, %82, %cst_82 {dimension_numbers = #tpu.dot_dimension_numbers<[1], [1], [0], [0], [0, 0, 1, 0], [], []>} : vector<8x8xf32>, vector<8x8xf32>, vector<8x8xf32> -> vector<8x8xf32>
    %86 = vector.broadcast %1 : vector<1x8xf32> to vector<8x8xf32>
    %87 = arith.addf %85, %86 : vector<8x8xf32>
    %cst_83 = arith.constant dense<0xFF800000> : vector<8xf32>
    %88 = vector.multi_reduction <maximumf>, %87, %cst_83 [1] : vector<8x8xf32> to vector<8xf32>
    %89 = vector.shape_cast %88 : vector<8xf32> to vector<8x1xf32>
    %90 = vector.broadcast %89 : vector<8x1xf32> to vector<8x8xf32>
    %91 = arith.subf %87, %90 : vector<8x8xf32>
    %92 = math.exp %91 : vector<8x8xf32>
    %cst_84 = arith.constant dense<0.000000e+00> : vector<8xf32>
    %93 = vector.multi_reduction <add>, %92, %cst_84 [1] : vector<8x8xf32> to vector<8xf32>
    %94 = vector.shape_cast %93 : vector<8xf32> to vector<8x1xf32>
    %cst_85 = arith.constant dense<0.000000e+00> : vector<8x8xf32>
    %95 = tpu.matmul %92, %84, %cst_85 {dimension_numbers = #tpu.dot_dimension_numbers<[1], [0], [0], [1], [0, 0, 1, 1], [], []>} : vector<8x8xf32>, vector<8x8xf32>, vector<8x8xf32> -> vector<8x8xf32>
    %96 = tpu.reciprocal %94 : vector<8x1xf32> -> vector<8x1xf32>
    %97 = vector.broadcast %96 : vector<8x1xf32> to vector<8x8xf32>
    %98 = arith.mulf %95, %97 : vector<8x8xf32>
    %c0_86 = arith.constant 0 : index
    %c0_87 = arith.constant 0 : index
    %c24 = arith.constant 24 : index
    %99 = vector.load %arg6[%c0_86, %c0_87, %c24] : memref<1x8x32xf32, #tpu.memory_space<vmem>>, vector<1x8x8xf32>
    %100 = vector.shape_cast %99 : vector<1x8x8xf32> to vector<8x8xf32>
    %101 = vector.shape_cast %98 : vector<8x8xf32> to vector<1x8x8xf32>
    tpu.vector_store %arg6[%c0_86, %c0_87, %c24], %101 {strides = array<i32>} : memref<1x8x32xf32, #tpu.memory_space<vmem>>, vector<1x8x8xf32>,
    return
  }
  func.func @transform_0(%arg0: i32, %arg1: i32) -> (i32, i32, i32, i32, i32) {
    %c0_i32 = arith.constant 0 : i32
    %c0_i32_0 = arith.constant 0 : i32
    %c0_i32_1 = arith.constant 0 : i32
    %c0_i32_2 = arith.constant 0 : i32
    return %arg0, %c0_i32, %c0_i32_0, %arg1, %c0_i32_1 : i32, i32, i32, i32, i32
  }
  func.func @transform_1(%arg0: i32, %arg1: i32) -> (i32, i32, i32, i32, i32) {
    %c0_i32 = arith.constant 0 : i32
    %c1_i32 = arith.constant 1 : i32
    %c0_i32_0 = arith.constant 0 : i32
    %c0_i32_1 = arith.constant 0 : i32
    return %arg0, %c0_i32, %c1_i32, %arg1, %c0_i32_0 : i32, i32, i32, i32, i32
  }
  func.func @transform_2(%arg0: i32, %arg1: i32) -> (i32, i32, i32, i32, i32) {
    %c0_i32 = arith.constant 0 : i32
    %c2_i32 = arith.constant 2 : i32
    %c0_i32_0 = arith.constant 0 : i32
    %c0_i32_1 = arith.constant 0 : i32
    return %arg0, %c0_i32, %c2_i32, %arg1, %c0_i32_0 : i32, i32, i32, i32, i32
  }
  func.func @transform_3(%arg0: i32, %arg1: i32) -> (i32, i32, i32, i32) {
    %c0_i32 = arith.constant 0 : i32
    %c0_i32_0 = arith.constant 0 : i32
    %c0_i32_1 = arith.constant 0 : i32
    %c0_i32_2 = arith.constant 0 : i32
    return %arg0, %c0_i32, %c0_i32_0, %c0_i32_1 : i32, i32, i32, i32
  }
  func.func @transform_4(%arg0: i32, %arg1: i32) -> (i32, i32, i32) {
    %c0_i32 = arith.constant 0 : i32
    %c0_i32_0 = arith.constant 0 : i32
    return %arg0, %c0_i32, %arg1 : i32, i32, i32
  }
}

module attributes {stable_mosaic.version = 11 : i64} {
  func.func @_linear_add_ln_kernel(%arg0: i32, %arg1: i32, %arg2: memref<16x32xf32, #tpu.memory_space<vmem>>, %arg3: memref<32x32xf32, #tpu.memory_space<vmem>>, %arg4: memref<1x32xf32, #tpu.memory_space<vmem>>, %arg5: memref<16x32xf32, #tpu.memory_space<vmem>>, %arg6: memref<1x32xf32, #tpu.memory_space<vmem>>, %arg7: memref<1x32xf32, #tpu.memory_space<vmem>>, %arg8: memref<16x32xf32, #tpu.memory_space<vmem>>, %arg9: memref<16x32xf32, #tpu.memory_space<vmem>>) attributes {dimension_semantics = [#tpu.dimension_semantics<parallel>, #tpu.dimension_semantics<arbitrary>], iteration_bounds = array<i64: 1, 1>, scalar_prefetch = 0 : i64, scratch_operands = 1 : i64, tpu.core_type = #tpu.core_type<tc>, window_params = [{transform_indices = @transform_0, window_bounds = array<i64: 16, 32>}, {transform_indices = @transform_1, window_bounds = array<i64: 32, 32>}, {pipeline_mode = #tpu.pipeline_mode<synchronous>, transform_indices = @transform_2, window_bounds = array<i64: 1, 32>}, {transform_indices = @transform_3, window_bounds = array<i64: 16, 32>}, {pipeline_mode = #tpu.pipeline_mode<synchronous>, transform_indices = @transform_4, window_bounds = array<i64: 1, 32>}, {pipeline_mode = #tpu.pipeline_mode<synchronous>, transform_indices = @transform_5, window_bounds = array<i64: 1, 32>}, {transform_indices = @transform_6, window_bounds = array<i64: 16, 32>}]} {
    %c0_i32 = arith.constant 0 : i32
    %0 = arith.cmpi eq, %arg1, %c0_i32 : i32
    %1 = arith.extui %0 : i1 to i32
    %c0_i32_0 = arith.constant 0 : i32
    %2 = arith.cmpi ne, %1, %c0_i32_0 : i32
    scf.if %2 {
      %cst_10 = arith.constant 0.000000e+00 : f32
      %12 = vector.broadcast %cst_10 : f32 to vector<16x32xf32>
      %c0_11 = arith.constant 0 : index
      %c0_12 = arith.constant 0 : index
      %13 = vector.load %arg9[%c0_11, %c0_12] : memref<16x32xf32, #tpu.memory_space<vmem>>, vector<16x32xf32>
      tpu.vector_store %arg9[%c0_11, %c0_12], %12 {strides = array<i32>} : memref<16x32xf32, #tpu.memory_space<vmem>>, vector<16x32xf32>,
    } else {
    }
    %c0 = arith.constant 0 : index
    %c0_1 = arith.constant 0 : index
    %3 = vector.load %arg9[%c0, %c0_1] : memref<16x32xf32, #tpu.memory_space<vmem>>, vector<16x32xf32>
    %c0_2 = arith.constant 0 : index
    %c0_3 = arith.constant 0 : index
    %4 = vector.load %arg2[%c0_2, %c0_3] : memref<16x32xf32, #tpu.memory_space<vmem>>, vector<16x32xf32>
    %c0_4 = arith.constant 0 : index
    %c0_5 = arith.constant 0 : index
    %5 = vector.load %arg3[%c0_4, %c0_5] : memref<32x32xf32, #tpu.memory_space<vmem>>, vector<32x32xf32>
    %cst = arith.constant dense<0.000000e+00> : vector<16x32xf32>
    %6 = tpu.matmul %4, %5, %cst {dimension_numbers = #tpu.dot_dimension_numbers<[1], [0], [0], [1], [0, 0, 1, 1], [], []>} : vector<16x32xf32>, vector<32x32xf32>, vector<16x32xf32> -> vector<16x32xf32>
    %7 = arith.addf %3, %6 : vector<16x32xf32>
    %c0_6 = arith.constant 0 : index
    %c0_7 = arith.constant 0 : index
    %8 = vector.load %arg9[%c0_6, %c0_7] : memref<16x32xf32, #tpu.memory_space<vmem>>, vector<16x32xf32>
    tpu.vector_store %arg9[%c0_6, %c0_7], %7 {strides = array<i32>} : memref<16x32xf32, #tpu.memory_space<vmem>>, vector<16x32xf32>,
    %c0_i32_8 = arith.constant 0 : i32
    %9 = arith.cmpi eq, %arg1, %c0_i32_8 : i32
    %10 = arith.extui %9 : i1 to i32
    %c0_i32_9 = arith.constant 0 : i32
    %11 = arith.cmpi ne, %10, %c0_i32_9 : i32
    scf.if %11 {
      %c0_10 = arith.constant 0 : index
      %c0_11 = arith.constant 0 : index
      %12 = vector.load %arg9[%c0_10, %c0_11] : memref<16x32xf32, #tpu.memory_space<vmem>>, vector<16x32xf32>
      %c0_12 = arith.constant 0 : index
      %c0_13 = arith.constant 0 : index
      %13 = vector.load %arg4[%c0_12, %c0_13] : memref<1x32xf32, #tpu.memory_space<vmem>>, vector<1x32xf32>
      %14 = vector.broadcast %13 : vector<1x32xf32> to vector<16x32xf32>
      %15 = arith.addf %12, %14 : vector<16x32xf32>
      %c0_14 = arith.constant 0 : index
      %c0_15 = arith.constant 0 : index
      %16 = vector.load %arg5[%c0_14, %c0_15] : memref<16x32xf32, #tpu.memory_space<vmem>>, vector<16x32xf32>
      %17 = arith.addf %15, %16 : vector<16x32xf32>
      %cst_16 = arith.constant dense<0.000000e+00> : vector<16xf32>
      %18 = vector.multi_reduction <add>, %17, %cst_16 [1] : vector<16x32xf32> to vector<16xf32>
      %19 = vector.shape_cast %18 : vector<16xf32> to vector<16x1xf32>
      %cst_17 = arith.constant 3.200000e+01 : f32
      %20 = vector.broadcast %cst_17 : f32 to vector<16x1xf32>
      %21 = arith.divf %19, %20 : vector<16x1xf32>
      %22 = vector.broadcast %21 : vector<16x1xf32> to vector<16x32xf32>
      %23 = arith.subf %17, %22 : vector<16x32xf32>
      %24 = arith.mulf %23, %23 : vector<16x32xf32>
      %cst_18 = arith.constant dense<0.000000e+00> : vector<16xf32>
      %25 = vector.multi_reduction <add>, %24, %cst_18 [1] : vector<16x32xf32> to vector<16xf32>
      %26 = vector.shape_cast %25 : vector<16xf32> to vector<16x1xf32>
      %cst_19 = arith.constant 3.200000e+01 : f32
      %27 = vector.broadcast %cst_19 : f32 to vector<16x1xf32>
      %28 = arith.divf %26, %27 : vector<16x1xf32>
      %cst_20 = arith.constant 9.99999996E-13 : f32
      %29 = vector.broadcast %cst_20 : f32 to vector<16x1xf32>
      %30 = arith.addf %28, %29 : vector<16x1xf32>
      %31 = math.rsqrt %30 : vector<16x1xf32>
      %32 = vector.broadcast %31 : vector<16x1xf32> to vector<16x32xf32>
      %33 = arith.mulf %23, %32 : vector<16x32xf32>
      %c0_21 = arith.constant 0 : index
      %c0_22 = arith.constant 0 : index
      %34 = vector.load %arg6[%c0_21, %c0_22] : memref<1x32xf32, #tpu.memory_space<vmem>>, vector<1x32xf32>
      %35 = vector.broadcast %34 : vector<1x32xf32> to vector<16x32xf32>
      %36 = arith.mulf %33, %35 : vector<16x32xf32>
      %c0_23 = arith.constant 0 : index
      %c0_24 = arith.constant 0 : index
      %37 = vector.load %arg7[%c0_23, %c0_24] : memref<1x32xf32, #tpu.memory_space<vmem>>, vector<1x32xf32>
      %38 = vector.broadcast %37 : vector<1x32xf32> to vector<16x32xf32>
      %39 = arith.addf %36, %38 : vector<16x32xf32>
      %c0_25 = arith.constant 0 : index
      %c0_26 = arith.constant 0 : index
      %40 = vector.load %arg8[%c0_25, %c0_26] : memref<16x32xf32, #tpu.memory_space<vmem>>, vector<16x32xf32>
      tpu.vector_store %arg8[%c0_25, %c0_26], %39 {strides = array<i32>} : memref<16x32xf32, #tpu.memory_space<vmem>>, vector<16x32xf32>,
    } else {
    }
    return
  }
  func.func @transform_0(%arg0: i32, %arg1: i32) -> (i32, i32) {
    %c0_i32 = arith.constant 0 : i32
    return %arg0, %arg1 : i32, i32
  }
  func.func @transform_1(%arg0: i32, %arg1: i32) -> (i32, i32) {
    %c0_i32 = arith.constant 0 : i32
    %c0_i32_0 = arith.constant 0 : i32
    return %arg1, %c0_i32 : i32, i32
  }
  func.func @transform_2(%arg0: i32, %arg1: i32) -> (i32, i32) {
    %c0_i32 = arith.constant 0 : i32
    %c0_i32_0 = arith.constant 0 : i32
    %c0_i32_1 = arith.constant 0 : i32
    return %c0_i32, %c0_i32_0 : i32, i32
  }
  func.func @transform_3(%arg0: i32, %arg1: i32) -> (i32, i32) {
    %c0_i32 = arith.constant 0 : i32
    %c0_i32_0 = arith.constant 0 : i32
    return %arg0, %c0_i32 : i32, i32
  }
  func.func @transform_4(%arg0: i32, %arg1: i32) -> (i32, i32) {
    %c0_i32 = arith.constant 0 : i32
    %c0_i32_0 = arith.constant 0 : i32
    %c0_i32_1 = arith.constant 0 : i32
    return %c0_i32, %c0_i32_0 : i32, i32
  }
  func.func @transform_5(%arg0: i32, %arg1: i32) -> (i32, i32) {
    %c0_i32 = arith.constant 0 : i32
    %c0_i32_0 = arith.constant 0 : i32
    %c0_i32_1 = arith.constant 0 : i32
    return %c0_i32, %c0_i32_0 : i32, i32
  }
  func.func @transform_6(%arg0: i32, %arg1: i32) -> (i32, i32) {
    %c0_i32 = arith.constant 0 : i32
    %c0_i32_0 = arith.constant 0 : i32
    return %arg0, %c0_i32 : i32, i32
  }
}

module attributes {stable_mosaic.version = 11 : i64} {
  func.func @_linear_kernel(%arg0: i32, %arg1: i32, %arg2: i32, %arg3: memref<16x32xf32, #tpu.memory_space<vmem>>, %arg4: memref<32x64xf32, #tpu.memory_space<vmem>>, %arg5: memref<1x64xf32, #tpu.memory_space<vmem>>, %arg6: memref<16x64xf32, #tpu.memory_space<vmem>>, %arg7: memref<16x64xf32, #tpu.memory_space<vmem>>) attributes {dimension_semantics = [#tpu.dimension_semantics<parallel>, #tpu.dimension_semantics<parallel>, #tpu.dimension_semantics<arbitrary>], iteration_bounds = array<i64: 1, 1, 1>, scalar_prefetch = 0 : i64, scratch_operands = 1 : i64, tpu.core_type = #tpu.core_type<tc>, window_params = [{transform_indices = @transform_0, window_bounds = array<i64: 16, 32>}, {transform_indices = @transform_1, window_bounds = array<i64: 32, 64>}, {transform_indices = @transform_2, window_bounds = array<i64: 1, 64>}, {transform_indices = @transform_3, window_bounds = array<i64: 16, 64>}]} {
    %c0_i32 = arith.constant 0 : i32
    %0 = arith.cmpi eq, %arg2, %c0_i32 : i32
    %1 = arith.extui %0 : i1 to i32
    %c0_i32_0 = arith.constant 0 : i32
    %2 = arith.cmpi ne, %1, %c0_i32_0 : i32
    scf.if %2 {
      %cst_10 = arith.constant 0.000000e+00 : f32
      %12 = vector.broadcast %cst_10 : f32 to vector<16x64xf32>
      %c0_11 = arith.constant 0 : index
      %c0_12 = arith.constant 0 : index
      %13 = vector.load %arg7[%c0_11, %c0_12] : memref<16x64xf32, #tpu.memory_space<vmem>>, vector<16x64xf32>
      tpu.vector_store %arg7[%c0_11, %c0_12], %12 {strides = array<i32>} : memref<16x64xf32, #tpu.memory_space<vmem>>, vector<16x64xf32>,
    } else {
    }
    %c0 = arith.constant 0 : index
    %c0_1 = arith.constant 0 : index
    %3 = vector.load %arg7[%c0, %c0_1] : memref<16x64xf32, #tpu.memory_space<vmem>>, vector<16x64xf32>
    %c0_2 = arith.constant 0 : index
    %c0_3 = arith.constant 0 : index
    %4 = vector.load %arg3[%c0_2, %c0_3] : memref<16x32xf32, #tpu.memory_space<vmem>>, vector<16x32xf32>
    %c0_4 = arith.constant 0 : index
    %c0_5 = arith.constant 0 : index
    %5 = vector.load %arg4[%c0_4, %c0_5] : memref<32x64xf32, #tpu.memory_space<vmem>>, vector<32x64xf32>
    %cst = arith.constant dense<0.000000e+00> : vector<16x64xf32>
    %6 = tpu.matmul %4, %5, %cst {dimension_numbers = #tpu.dot_dimension_numbers<[1], [0], [0], [1], [0, 0, 1, 1], [], []>} : vector<16x32xf32>, vector<32x64xf32>, vector<16x64xf32> -> vector<16x64xf32>
    %7 = arith.addf %3, %6 : vector<16x64xf32>
    %c0_6 = arith.constant 0 : index
    %c0_7 = arith.constant 0 : index
    %8 = vector.load %arg7[%c0_6, %c0_7] : memref<16x64xf32, #tpu.memory_space<vmem>>, vector<16x64xf32>
    tpu.vector_store %arg7[%c0_6, %c0_7], %7 {strides = array<i32>} : memref<16x64xf32, #tpu.memory_space<vmem>>, vector<16x64xf32>,
    %c0_i32_8 = arith.constant 0 : i32
    %9 = arith.cmpi eq, %arg2, %c0_i32_8 : i32
    %10 = arith.extui %9 : i1 to i32
    %c0_i32_9 = arith.constant 0 : i32
    %11 = arith.cmpi ne, %10, %c0_i32_9 : i32
    scf.if %11 {
      %c0_10 = arith.constant 0 : index
      %c0_11 = arith.constant 0 : index
      %12 = vector.load %arg7[%c0_10, %c0_11] : memref<16x64xf32, #tpu.memory_space<vmem>>, vector<16x64xf32>
      %c0_12 = arith.constant 0 : index
      %c0_13 = arith.constant 0 : index
      %13 = vector.load %arg5[%c0_12, %c0_13] : memref<1x64xf32, #tpu.memory_space<vmem>>, vector<1x64xf32>
      %14 = vector.broadcast %13 : vector<1x64xf32> to vector<16x64xf32>
      %15 = arith.addf %12, %14 : vector<16x64xf32>
      %cst_14 = arith.constant 0.000000e+00 : f32
      %16 = vector.broadcast %cst_14 : f32 to vector<16x64xf32>
      %17 = arith.maximumf %15, %16 : vector<16x64xf32>
      %c0_15 = arith.constant 0 : index
      %c0_16 = arith.constant 0 : index
      %18 = vector.load %arg6[%c0_15, %c0_16] : memref<16x64xf32, #tpu.memory_space<vmem>>, vector<16x64xf32>
      tpu.vector_store %arg6[%c0_15, %c0_16], %17 {strides = array<i32>} : memref<16x64xf32, #tpu.memory_space<vmem>>, vector<16x64xf32>,
    } else {
    }
    return
  }
  func.func @transform_0(%arg0: i32, %arg1: i32, %arg2: i32) -> (i32, i32) {
    %c0_i32 = arith.constant 0 : i32
    return %arg0, %arg2 : i32, i32
  }
  func.func @transform_1(%arg0: i32, %arg1: i32, %arg2: i32) -> (i32, i32) {
    %c0_i32 = arith.constant 0 : i32
    return %arg2, %arg1 : i32, i32
  }
  func.func @transform_2(%arg0: i32, %arg1: i32, %arg2: i32) -> (i32, i32) {
    %c0_i32 = arith.constant 0 : i32
    %c0_i32_0 = arith.constant 0 : i32
    return %c0_i32, %arg1 : i32, i32
  }
  func.func @transform_3(%arg0: i32, %arg1: i32, %arg2: i32) -> (i32, i32) {
    %c0_i32 = arith.constant 0 : i32
    return %arg0, %arg1 : i32, i32
  }
}

module attributes {stable_mosaic.version = 11 : i64} {
  func.func @_linear_add_ln_kernel(%arg0: i32, %arg1: i32, %arg2: memref<16x64xf32, #tpu.memory_space<vmem>>, %arg3: memref<64x32xf32, #tpu.memory_space<vmem>>, %arg4: memref<1x32xf32, #tpu.memory_space<vmem>>, %arg5: memref<16x32xf32, #tpu.memory_space<vmem>>, %arg6: memref<1x32xf32, #tpu.memory_space<vmem>>, %arg7: memref<1x32xf32, #tpu.memory_space<vmem>>, %arg8: memref<16x32xf32, #tpu.memory_space<vmem>>, %arg9: memref<16x32xf32, #tpu.memory_space<vmem>>) attributes {dimension_semantics = [#tpu.dimension_semantics<parallel>, #tpu.dimension_semantics<arbitrary>], iteration_bounds = array<i64: 1, 1>, scalar_prefetch = 0 : i64, scratch_operands = 1 : i64, tpu.core_type = #tpu.core_type<tc>, window_params = [{transform_indices = @transform_0, window_bounds = array<i64: 16, 64>}, {transform_indices = @transform_1, window_bounds = array<i64: 64, 32>}, {pipeline_mode = #tpu.pipeline_mode<synchronous>, transform_indices = @transform_2, window_bounds = array<i64: 1, 32>}, {transform_indices = @transform_3, window_bounds = array<i64: 16, 32>}, {pipeline_mode = #tpu.pipeline_mode<synchronous>, transform_indices = @transform_4, window_bounds = array<i64: 1, 32>}, {pipeline_mode = #tpu.pipeline_mode<synchronous>, transform_indices = @transform_5, window_bounds = array<i64: 1, 32>}, {transform_indices = @transform_6, window_bounds = array<i64: 16, 32>}]} {
    %c0_i32 = arith.constant 0 : i32
    %0 = arith.cmpi eq, %arg1, %c0_i32 : i32
    %1 = arith.extui %0 : i1 to i32
    %c0_i32_0 = arith.constant 0 : i32
    %2 = arith.cmpi ne, %1, %c0_i32_0 : i32
    scf.if %2 {
      %cst_10 = arith.constant 0.000000e+00 : f32
      %12 = vector.broadcast %cst_10 : f32 to vector<16x32xf32>
      %c0_11 = arith.constant 0 : index
      %c0_12 = arith.constant 0 : index
      %13 = vector.load %arg9[%c0_11, %c0_12] : memref<16x32xf32, #tpu.memory_space<vmem>>, vector<16x32xf32>
      tpu.vector_store %arg9[%c0_11, %c0_12], %12 {strides = array<i32>} : memref<16x32xf32, #tpu.memory_space<vmem>>, vector<16x32xf32>,
    } else {
    }
    %c0 = arith.constant 0 : index
    %c0_1 = arith.constant 0 : index
    %3 = vector.load %arg9[%c0, %c0_1] : memref<16x32xf32, #tpu.memory_space<vmem>>, vector<16x32xf32>
    %c0_2 = arith.constant 0 : index
    %c0_3 = arith.constant 0 : index
    %4 = vector.load %arg2[%c0_2, %c0_3] : memref<16x64xf32, #tpu.memory_space<vmem>>, vector<16x64xf32>
    %c0_4 = arith.constant 0 : index
    %c0_5 = arith.constant 0 : index
    %5 = vector.load %arg3[%c0_4, %c0_5] : memref<64x32xf32, #tpu.memory_space<vmem>>, vector<64x32xf32>
    %cst = arith.constant dense<0.000000e+00> : vector<16x32xf32>
    %6 = tpu.matmul %4, %5, %cst {dimension_numbers = #tpu.dot_dimension_numbers<[1], [0], [0], [1], [0, 0, 1, 1], [], []>} : vector<16x64xf32>, vector<64x32xf32>, vector<16x32xf32> -> vector<16x32xf32>
    %7 = arith.addf %3, %6 : vector<16x32xf32>
    %c0_6 = arith.constant 0 : index
    %c0_7 = arith.constant 0 : index
    %8 = vector.load %arg9[%c0_6, %c0_7] : memref<16x32xf32, #tpu.memory_space<vmem>>, vector<16x32xf32>
    tpu.vector_store %arg9[%c0_6, %c0_7], %7 {strides = array<i32>} : memref<16x32xf32, #tpu.memory_space<vmem>>, vector<16x32xf32>,
    %c0_i32_8 = arith.constant 0 : i32
    %9 = arith.cmpi eq, %arg1, %c0_i32_8 : i32
    %10 = arith.extui %9 : i1 to i32
    %c0_i32_9 = arith.constant 0 : i32
    %11 = arith.cmpi ne, %10, %c0_i32_9 : i32
    scf.if %11 {
      %c0_10 = arith.constant 0 : index
      %c0_11 = arith.constant 0 : index
      %12 = vector.load %arg9[%c0_10, %c0_11] : memref<16x32xf32, #tpu.memory_space<vmem>>, vector<16x32xf32>
      %c0_12 = arith.constant 0 : index
      %c0_13 = arith.constant 0 : index
      %13 = vector.load %arg4[%c0_12, %c0_13] : memref<1x32xf32, #tpu.memory_space<vmem>>, vector<1x32xf32>
      %14 = vector.broadcast %13 : vector<1x32xf32> to vector<16x32xf32>
      %15 = arith.addf %12, %14 : vector<16x32xf32>
      %c0_14 = arith.constant 0 : index
      %c0_15 = arith.constant 0 : index
      %16 = vector.load %arg5[%c0_14, %c0_15] : memref<16x32xf32, #tpu.memory_space<vmem>>, vector<16x32xf32>
      %17 = arith.addf %15, %16 : vector<16x32xf32>
      %cst_16 = arith.constant dense<0.000000e+00> : vector<16xf32>
      %18 = vector.multi_reduction <add>, %17, %cst_16 [1] : vector<16x32xf32> to vector<16xf32>
      %19 = vector.shape_cast %18 : vector<16xf32> to vector<16x1xf32>
      %cst_17 = arith.constant 3.200000e+01 : f32
      %20 = vector.broadcast %cst_17 : f32 to vector<16x1xf32>
      %21 = arith.divf %19, %20 : vector<16x1xf32>
      %22 = vector.broadcast %21 : vector<16x1xf32> to vector<16x32xf32>
      %23 = arith.subf %17, %22 : vector<16x32xf32>
      %24 = arith.mulf %23, %23 : vector<16x32xf32>
      %cst_18 = arith.constant dense<0.000000e+00> : vector<16xf32>
      %25 = vector.multi_reduction <add>, %24, %cst_18 [1] : vector<16x32xf32> to vector<16xf32>
      %26 = vector.shape_cast %25 : vector<16xf32> to vector<16x1xf32>
      %cst_19 = arith.constant 3.200000e+01 : f32
      %27 = vector.broadcast %cst_19 : f32 to vector<16x1xf32>
      %28 = arith.divf %26, %27 : vector<16x1xf32>
      %cst_20 = arith.constant 9.99999996E-13 : f32
      %29 = vector.broadcast %cst_20 : f32 to vector<16x1xf32>
      %30 = arith.addf %28, %29 : vector<16x1xf32>
      %31 = math.rsqrt %30 : vector<16x1xf32>
      %32 = vector.broadcast %31 : vector<16x1xf32> to vector<16x32xf32>
      %33 = arith.mulf %23, %32 : vector<16x32xf32>
      %c0_21 = arith.constant 0 : index
      %c0_22 = arith.constant 0 : index
      %34 = vector.load %arg6[%c0_21, %c0_22] : memref<1x32xf32, #tpu.memory_space<vmem>>, vector<1x32xf32>
      %35 = vector.broadcast %34 : vector<1x32xf32> to vector<16x32xf32>
      %36 = arith.mulf %33, %35 : vector<16x32xf32>
      %c0_23 = arith.constant 0 : index
      %c0_24 = arith.constant 0 : index
      %37 = vector.load %arg7[%c0_23, %c0_24] : memref<1x32xf32, #tpu.memory_space<vmem>>, vector<1x32xf32>
      %38 = vector.broadcast %37 : vector<1x32xf32> to vector<16x32xf32>
      %39 = arith.addf %36, %38 : vector<16x32xf32>
      %c0_25 = arith.constant 0 : index
      %c0_26 = arith.constant 0 : index
      %40 = vector.load %arg8[%c0_25, %c0_26] : memref<16x32xf32, #tpu.memory_space<vmem>>, vector<16x32xf32>
      tpu.vector_store %arg8[%c0_25, %c0_26], %39 {strides = array<i32>} : memref<16x32xf32, #tpu.memory_space<vmem>>, vector<16x32xf32>,
    } else {
    }
    return
  }
  func.func @transform_0(%arg0: i32, %arg1: i32) -> (i32, i32) {
    %c0_i32 = arith.constant 0 : i32
    return %arg0, %arg1 : i32, i32
  }
  func.func @transform_1(%arg0: i32, %arg1: i32) -> (i32, i32) {
    %c0_i32 = arith.constant 0 : i32
    %c0_i32_0 = arith.constant 0 : i32
    return %arg1, %c0_i32 : i32, i32
  }
  func.func @transform_2(%arg0: i32, %arg1: i32) -> (i32, i32) {
    %c0_i32 = arith.constant 0 : i32
    %c0_i32_0 = arith.constant 0 : i32
    %c0_i32_1 = arith.constant 0 : i32
    return %c0_i32, %c0_i32_0 : i32, i32
  }
  func.func @transform_3(%arg0: i32, %arg1: i32) -> (i32, i32) {
    %c0_i32 = arith.constant 0 : i32
    %c0_i32_0 = arith.constant 0 : i32
    return %arg0, %c0_i32 : i32, i32
  }
  func.func @transform_4(%arg0: i32, %arg1: i32) -> (i32, i32) {
    %c0_i32 = arith.constant 0 : i32
    %c0_i32_0 = arith.constant 0 : i32
    %c0_i32_1 = arith.constant 0 : i32
    return %c0_i32, %c0_i32_0 : i32, i32
  }
  func.func @transform_5(%arg0: i32, %arg1: i32) -> (i32, i32) {
    %c0_i32 = arith.constant 0 : i32
    %c0_i32_0 = arith.constant 0 : i32
    %c0_i32_1 = arith.constant 0 : i32
    return %c0_i32, %c0_i32_0 : i32, i32
  }
  func.func @transform_6(%arg0: i32, %arg1: i32) -> (i32, i32) {
    %c0_i32 = arith.constant 0 : i32
    %c0_i32_0 = arith.constant 0 : i32
    return %arg0, %c0_i32 : i32, i32
  }
}

</mosaic_0001>

<bundles_post_ra>
// kernel: encoder_forward.5
= control target key start
LH: loop header
LB: loop body
LE: loop exit
PB: predicated region body
PF: predicated region fallthrough
CT: control target
= control target key end

     0   :  { %vm29_vm0 = vcmask 261120   ;;  %vm18_vm1 = vcmask 785408   ;;  %v165_v3 = vmov 0.0   ;;  %s221_s1 = inlined_call_operand.vmem [shape: f32[32,96], index: 1, kind: input, shape index: {}]   ;;  %s222_s0 = inlined_call_operand.vmem [shape: f32[16,32], index: 0, kind: input, shape index: {}]   ;;  %s223_s2 = inlined_call_operand.vmem [shape: f32[1,96], index: 2, kind: input, shape index: {}]   ;;  %s224_s3 = inlined_call_operand.vmem [shape: f32[16,96], index: 3, kind: output, shape index: {}]  }
   0x1   :  { %v25_v0 = vld [vmem:[%s221_s1] sm:$0xff]  ;;  %v26_v1 = vld [vmem:[%s221_s1 + $0x8] sm:$0xff]  ;;  %v27_v2 = vld [vmem:[%s221_s1 + $0x10] sm:$0xff]  ;;  %20 = vst.msk [vmem:[#allocation2 + $0x8] sm:$0xff] %vm18_vm1, %v165_v3 }
   0x2   :  { %19 = vst.msk [vmem:[#allocation2] sm:$0xff] %vm18_vm1, %v165_v3  ;;  %v156_v4 = vpack.c.bf16 %v26_v1, %v25_v0  ;;  %v28_v5 = vld [vmem:[%s221_s1 + $0x18] sm:$0xff]  ;;  %v23_v6 = vld [vmem:[%s222_s0] sm:$0xff]  ;;  %v24_v8 = vld [vmem:[%s222_s0 + $0x8] sm:$0xff] }
   0x3   :  { %v160_v7 = vpack.c.bf16 %v28_v5, %v27_v2  ;;  %153 = vmatprep.mubr.msk.f32.mxu0 %vm29_vm0, %v23_v6  ;;  %v138_v15 = vld [vmem:[%s223_s2] ss:$0 sm:$0xff] }
   0x4   :  { %157 = vmatprep.subr.bf16.mxu0 %v156_v4 }
   0x5   :  { %159 = vmatpush3.bf16.msra.mxu0 %v156_v4 }
   0x6   :  { %161 = vmatprep.subr.bf16.mxu0 %v160_v7 }
   0x8   :  { %v22_v9 = vld [vmem:[#allocation2 + $0x8] sm:$0xff] }
   0x9   :  { %163 = vmatpush3.bf16.msra.mxu0 %v160_v7  ;;  %v21_v10 = vld [vmem:[#allocation2] sm:$0xff] }
   0xc   :  { %154 = vmatmul.mubr.msk.f32.vlgmr.msra.gmra.mrb[0].mxu0 %vm29_vm0, %v24_v8 }
  0xdf   :  { %v155_v11 = vpop.f32.mrb[0].mxu0 }
  0xe0   :  { %v112_v12 = vadd.f32 %v155_v11, %v22_v9  ;;  %v102_v13 = vpop.f32.mrb[1].mxu0 }
  0xe1   :  { %v111_v14 = vadd.f32 %v102_v13, %v21_v10 }
  0xe2   :  { %115 = vst.msk [vmem:[#allocation2 + $0x8] sm:$0xff] %vm18_vm1, %v112_v12 }
  0xe3   :  { %114 = vst.msk [vmem:[#allocation2] sm:$0xff] %vm18_vm1, %v111_v14 }
  0xe9   :  { %v120_v16 = vld [vmem:[#allocation2 + $0x8] sm:$0xff] }
  0xea   :  { %v129_v17 = vadd.f32 %v138_v15, %v120_v16  ;;  %v119_v18 = vld [vmem:[#allocation2] sm:$0xff] }
  0xeb   :  { %v128_v19 = vadd.f32 %v138_v15, %v119_v18 }
  0xec   :  { %131 = vst.msk [vmem:[%s224_s3 + $0x8] sm:$0xff] %vm18_vm1, %v129_v17 }
  0xed   :  { %130 = vst.msk [vmem:[%s224_s3] sm:$0xff] %vm18_vm1, %v128_v19 }

// kernel: encoder_forward.7
= control target key start
LH: loop header
LB: loop body
LE: loop exit
PB: predicated region body
PF: predicated region fallthrough
CT: control target
= control target key end

     0   :  { %vm27_vm0 = vcmask 261120   ;;  %v228_v3 = vmov 0.0   ;;  %s315_s1 = inlined_call_operand.vmem [shape: f32[32,32], index: 1, kind: input, shape index: {}]   ;;  %s316_s0 = inlined_call_operand.vmem [shape: f32[16,32], index: 0, kind: input, shape index: {}]   ;;  %s317_s2 = inlined_call_operand.vmem [shape: f32[1,32], index: 2, kind: input, shape index: {}]   ;;  %s318_s3 = inlined_call_operand.vmem [shape: f32[16,32], index: 3, kind: input, shape index: {}]   ;;  %s319_s4 = inlined_call_operand.vmem [shape: f32[1,32], index: 4, kind: input, shape index: {}]   ;;  %s320_s5 = inlined_call_operand.vmem [shape: f32[1,32], index: 5, kind: input, shape index: {}]   ;;  %s321_s6 = inlined_call_operand.vmem [shape: f32[16,32], index: 6, kind: output, shape index: {}]  }
   0x1   :  { %v34_v0 = vld [vmem:[%s315_s1] sm:$0xff]  ;;  %v35_v1 = vld [vmem:[%s315_s1 + $0x8] sm:$0xff]  ;;  %v36_v2 = vld [vmem:[%s315_s1 + $0x10] sm:$0xff]  ;;  %29 = vst.msk [vmem:[#allocation2 + $0x8] sm:$0xff] %vm27_vm0, %v228_v3 }
   0x2   :  { %28 = vst.msk [vmem:[#allocation2] sm:$0xff] %vm27_vm0, %v228_v3  ;;  %v215_v4 = vpack.c.bf16 %v35_v1, %v34_v0  ;;  %v37_v5 = vld [vmem:[%s315_s1 + $0x18] sm:$0xff]  ;;  %v32_v6 = vld [vmem:[%s316_s0] sm:$0xff]  ;;  %v33_v8 = vld [vmem:[%s316_s0 + $0x8] sm:$0xff] }
   0x3   :  { %v219_v7 = vpack.c.bf16 %v37_v5, %v36_v2  ;;  %212 = vmatprep.mubr.msk.f32.mxu0 %vm27_vm0, %v32_v6  ;;  %v195_v15 = vld [vmem:[%s317_s2] ss:$0 sm:$0xff]  ;;  %v139_v21 = vld [vmem:[%s318_s3 + $0x8] sm:$0xff] }
   0x4   :  { %216 = vmatprep.subr.bf16.mxu0 %v215_v4  ;;  %v138_v18 = vld [vmem:[%s318_s3] sm:$0xff] }
   0x5   :  { %218 = vmatpush3.bf16.msra.mxu0 %v215_v4  ;;  %v196_v43 = vld [vmem:[%s319_s4] ss:$0 sm:$0xff] }
   0x6   :  { %220 = vmatprep.subr.bf16.mxu0 %v219_v7  ;;  %v197_v45 = vld [vmem:[%s320_s5] ss:$0 sm:$0xff] }
   0x8   :  { %v31_v9 = vld [vmem:[#allocation2 + $0x8] sm:$0xff] }
   0x9   :  { %222 = vmatpush3.bf16.msra.mxu0 %v219_v7  ;;  %v30_v10 = vld [vmem:[#allocation2] sm:$0xff] }
   0xc   :  { %213 = vmatmul.mubr.msk.f32.vlgmr.msra.gmra.mrb[0].mxu0 %vm27_vm0, %v33_v8 }
  0xdf   :  { %v214_v11 = vpop.f32.mrb[0].mxu0 }
  0xe0   :  { %v121_v12 = vadd.f32 %v214_v11, %v31_v9  ;;  %v111_v13 = vpop.f32.mrb[1].mxu0 }
  0xe1   :  { %v120_v14 = vadd.f32 %v111_v13, %v30_v10 }
  0xe2   :  { %123 = vst.msk [vmem:[#allocation2 + $0x8] sm:$0xff] %vm27_vm0, %v121_v12 }
  0xe3   :  { %122 = vst.msk [vmem:[#allocation2] sm:$0xff] %vm27_vm0, %v120_v14 }
  0xe9   :  { %v128_v16 = vld [vmem:[#allocation2 + $0x8] sm:$0xff] }
  0xea   :  { %v127_v17 = vld [vmem:[#allocation2] sm:$0xff]  ;;  %v137_v20 = vadd.f32 %v195_v15, %v128_v16 }
  0xeb   :  { %v136_v19 = vadd.f32 %v195_v15, %v127_v17 }
  0xec   :  { %v141_v24 = vadd.f32 %v139_v21, %v137_v20 }
  0xed   :  { %v140_v22 = vadd.f32 %v138_v18, %v136_v19 }
  0xee   :  { %v145_v25 = vsel %vm27_vm0, %v141_v24, 0.0 }
  0xef   :  { %v142_v23 = vsel %vm27_vm0, %v140_v22, 0.0 }
  0xf0   :  { %143 = vadd.xlane.f32.xlu0 %v142_v23 }
  0xf4   :  { %146 = vadd.xlane.f32.xlu0 %v145_v25 }
 0x17d   :  { %v144_v26 = vpop.xlane.xlu0 %143 }
 0x17e   :  { %v149_v27 = vmul.f32 0.03125, %v144_v26 }
 0x180   :  { %v151_v28 = vsub.f32 %v140_v22, %v149_v27 }
 0x181   :  { %v147_v29 = vpop.xlane.xlu0 %146 }
 0x182   :  { %v150_v30 = vmul.f32 0.03125, %v147_v29  ;;  %v153_v31 = vmul.f32 %v151_v28, %v151_v28 }
 0x184   :  { %v152_v32 = vsub.f32 %v141_v24, %v150_v30  ;;  %v155_v33 = vsel %vm27_vm0, %v153_v31, 0.0 }
 0x185   :  { %156 = vadd.xlane.f32.xlu1 %v155_v33 }
 0x186   :  { %v154_v34 = vmul.f32 %v152_v32, %v152_v32 }
 0x188   :  { %v158_v35 = vsel %vm27_vm0, %v154_v34, 0.0 }
 0x189   :  { %159 = vadd.xlane.f32.xlu1 %v158_v35 }
 0x212   :  { %v157_v36 = vpop.xlane.xlu1 %156 }
 0x213   :  { %v161_v37 = vmul.f32 0.03125, %v157_v36 }
 0x215   :  { %v163_v38 = vadd.f32 1e-12, %v161_v37 }
 0x216   :  { %v160_v39 = vpop.xlane.xlu1 %159 }
 0x217   :  { %224 = vrsqrt.f32 %v163_v38  ;;  %v162_v40 = vmul.f32 0.03125, %v160_v39 }
 0x219   :  { %v164_v41 = vadd.f32 1e-12, %v162_v40 }
 0x21b   :  { %226 = vrsqrt.f32 %v164_v41 }
 0x221   :  { %v225_v42 = vpop.eup %224 }
 0x222   :  { %v167_v44 = vmul.f32 %v225_v42, %v151_v28 }
 0x224   :  { %v176_v46 = vmul.f32 %v196_v43, %v167_v44 }
 0x225   :  { %v227_v47 = vpop.eup %226 }
 0x226   :  { %v185_v48 = vadd.f32 %v197_v45, %v176_v46  ;;  %v168_v49 = vmul.f32 %v227_v47, %v152_v32 }
 0x228   :  { %187 = vst.msk [vmem:[%s321_s6] sm:$0xff] %vm27_vm0, %v185_v48  ;;  %v177_v50 = vmul.f32 %v196_v43, %v168_v49 }
 0x22a   :  { %v186_v51 = vadd.f32 %v197_v45, %v177_v50 }
 0x22c   :  { %188 = vst.msk [vmem:[%s321_s6 + $0x8] sm:$0xff] %vm27_vm0, %v186_v51 }

// kernel: encoder_forward.8
= control target key start
LH: loop header
LB: loop body
LE: loop exit
PB: predicated region body
PF: predicated region fallthrough
CT: control target
= control target key end

     0   :  { %vm29_vm0 = vcmask 261120   ;;  %vm18_vm1 = vcmask 523264   ;;  %v167_v3 = vmov 0.0   ;;  %s223_s1 = inlined_call_operand.vmem [shape: f32[32,64], index: 1, kind: input, shape index: {}]   ;;  %s224_s0 = inlined_call_operand.vmem [shape: f32[16,32], index: 0, kind: input, shape index: {}]   ;;  %s225_s2 = inlined_call_operand.vmem [shape: f32[1,64], index: 2, kind: input, shape index: {}]   ;;  %s226_s3 = inlined_call_operand.vmem [shape: f32[16,64], index: 3, kind: output, shape index: {}]  }
   0x1   :  { %v25_v0 = vld [vmem:[%s223_s1] sm:$0xff]  ;;  %v26_v1 = vld [vmem:[%s223_s1 + $0x8] sm:$0xff]  ;;  %v27_v2 = vld [vmem:[%s223_s1 + $0x10] sm:$0xff]  ;;  %20 = vst.msk [vmem:[#allocation2 + $0x8] sm:$0xff] %vm18_vm1, %v167_v3 }
   0x2   :  { %19 = vst.msk [vmem:[#allocation2] sm:$0xff] %vm18_vm1, %v167_v3  ;;  %v158_v4 = vpack.c.bf16 %v26_v1, %v25_v0  ;;  %v28_v5 = vld [vmem:[%s223_s1 + $0x18] sm:$0xff]  ;;  %v23_v6 = vld [vmem:[%s224_s0] sm:$0xff]  ;;  %v24_v8 = vld [vmem:[%s224_s0 + $0x8] sm:$0xff] }
   0x3   :  { %v162_v7 = vpack.c.bf16 %v28_v5, %v27_v2  ;;  %155 = vmatprep.mubr.msk.f32.mxu0 %vm29_vm0, %v23_v6  ;;  %v140_v15 = vld [vmem:[%s225_s2] ss:$0 sm:$0xff] }
   0x4   :  { %159 = vmatprep.subr.bf16.mxu0 %v158_v4 }
   0x5   :  { %161 = vmatpush3.bf16.msra.mxu0 %v158_v4 }
   0x6   :  { %163 = vmatprep.subr.bf16.mxu0 %v162_v7 }
   0x8   :  { %v22_v9 = vld [vmem:[#allocation2 + $0x8] sm:$0xff] }
   0x9   :  { %165 = vmatpush3.bf16.msra.mxu0 %v162_v7  ;;  %v21_v10 = vld [vmem:[#allocation2] sm:$0xff] }
   0xc   :  { %156 = vmatmul.mubr.msk.f32.vlgmr.msra.gmra.mrb[0].mxu0 %vm29_vm0, %v24_v8 }
  0xdf   :  { %v157_v11 = vpop.f32.mrb[0].mxu0 }
  0xe0   :  { %v112_v12 = vadd.f32 %v157_v11, %v22_v9  ;;  %v102_v13 = vpop.f32.mrb[1].mxu0 }
  0xe1   :  { %v111_v14 = vadd.f32 %v102_v13, %v21_v10 }
  0xe2   :  { %115 = vst.msk [vmem:[#allocation2 + $0x8] sm:$0xff] %vm18_vm1, %v112_v12 }
  0xe3   :  { %114 = vst.msk [vmem:[#allocation2] sm:$0xff] %vm18_vm1, %v111_v14 }
  0xe9   :  { %v120_v16 = vld [vmem:[#allocation2 + $0x8] sm:$0xff] }
  0xea   :  { %v129_v17 = vadd.f32 %v140_v15, %v120_v16  ;;  %v119_v18 = vld [vmem:[#allocation2] sm:$0xff] }
  0xeb   :  { %v128_v19 = vadd.f32 %v140_v15, %v119_v18 }
  0xec   :  { %v131_v20 = vmax.f32 %v129_v17, 0.0 }
  0xed   :  { %v130_v21 = vmax.f32 %v128_v19, 0.0 }
  0xee   :  { %133 = vst.msk [vmem:[%s226_s3 + $0x8] sm:$0xff] %vm18_vm1, %v131_v20 }
  0xef   :  { %132 = vst.msk [vmem:[%s226_s3] sm:$0xff] %vm18_vm1, %v130_v21 }

// kernel: encoder_forward.6
= control target key start
LH: loop header
LB: loop body
LE: loop exit
PB: predicated region body
PF: predicated region fallthrough
CT: control target
= control target key end

     0   :  { %s1917_s15 = smov 0   ;;  %s1919_s16 = smov 0   ;;  %s2308_s0 = inlined_call_operand.vmem [shape: f32[2,8,3,4,8], index: 0, kind: input, shape index: {}, may-alias: {0,1,2}]   ;;  %s2309_s1 = inlined_call_operand.vmem [shape: f32[2,8,3,4,8], index: 1, kind: input, shape index: {}, may-alias: {0,1,2}]   ;;  %s2310_s2 = inlined_call_operand.vmem [shape: f32[2,8,3,4,8], index: 2, kind: input, shape index: {}, may-alias: {0,1,2}]   ;;  %s2311_s3 = inlined_call_operand.vmem [shape: f32[2,1,1,8], index: 3, kind: input, shape index: {}]   ;;  %s2312_s4 = inlined_call_operand.vmem [shape: f32[2,8,32], index: 4, kind: output, shape index: {}]  }
   0x1   :  { %s1921_s17 = smov 0   ;;  %s1923_s18 = smov 0  }
   0x2   :  { %s1925_s19 = smov 0  }
   0x3 LB: > { %s26_s20 = sadd.s32 1, %s1881_s18  ;;  %p42_p1 = scmp.ne.s32.totalorder %s1873_s16, %s1869_s15  ;;  %s1885_s19 = sphi %s1925_s19, %s14_s19   ;;  %s1881_s18 = sphi %s1923_s18, %s2317_s18   ;;  %s1877_s17 = sphi %s1921_s17, %s2316_s17   ;;  %s1873_s16 = sphi %s1919_s16, %s2315_s16   ;;  %s1869_s15 = sphi %s1917_s15, %s2314_s15  }
   0x4   : > { %p28_p0 = scmp.ge.s32.totalorder %s26_s20, 2  ;;  %p43_p2 = scmp.eq.s32.totalorder %s1885_s19, 0 }
   0x5   : > { %s35_s23 = sadd.s32 1, %s1873_s16  ;;  %p1686_p5 = scmp.ge.s32.totalorder %s1885_s19, 2 }
   0x6   : > { %s2319_s20 = smov (%p28_p0, %s26_s20), 0  ;;  %p1948_p3 = por %p43_p2, %p42_p1 }
   0x7   : > { %s30_s22 = ssub.s32 %s1881_s18, %s2319_s20  ;;  %178 = sbr.rel (%p1686_p5) target bundleno = 44 (0x2c), region = 16 }
   0x8   : > { %p33_p4 = scmp.eq.s32.totalorder %s30_s22, 0 }
   0xa   : > { %s1956_s24 = scalar_select %p33_p4, %s1873_s16, %s35_s23  }
   0xe   : > { %181 = sbr.rel (!%p1948_p3) target bundleno = 24 (0x18), region = 20  ;;  %s183_s25 = sand.u32 (%p1948_p3), 1, %s1873_s16  }
   0xf   : > { %s1785_s26 = smul.u32 (%p1948_p3), 96, %s1881_s18  ;;  %s1687_s27 = sshll.u32 (%p1948_p3), %s183_s25, 5 }
  0x10   : > { %s185_s5 = scalar_lea.vmem (%p1948_p3), [#allocation2], %s1687_s27 }
  0x11   : > { %s189_s30 = scalar_lea.vmem (%p1948_p3), %s2308_s0, %s1785_s26 }
  0x12   : > { %v205_v0 = vld [vmem:[%s189_s30] sm:$0xf] (%p1948_p3)  ;;  %v207_v1 = vld [vmem:[%s189_s30 + $0xc] sm:$0xf] (%p1948_p3)  ;;  %v209_v2 = vld [vmem:[%s189_s30 + $0x18] sm:$0xf] (%p1948_p3) }
  0x13   : > { %206 = vst [vmem:[%s185_s5] sm:$0xf] (%p1948_p3), %v205_v0  ;;  %208 = vst [vmem:[%s185_s5 + $0x4] sm:$0xf] (%p1948_p3), %v207_v1  ;;  %v211_v3 = vld [vmem:[%s189_s30 + $0x24] sm:$0xf] (%p1948_p3) }
  0x14   : > { %210 = vst [vmem:[%s185_s5 + $0x8] sm:$0xf] (%p1948_p3), %v209_v2  ;;  %v213_v4 = vld [vmem:[%s189_s30 + $0x30] sm:$0xf] (%p1948_p3)  ;;  %v215_v5 = vld [vmem:[%s189_s30 + $0x3c] sm:$0xf] (%p1948_p3) }
  0x15   : > { %212 = vst [vmem:[%s185_s5 + $0xc] sm:$0xf] %v211_v3  ;;  %214 = vst [vmem:[%s185_s5 + $0x10] sm:$0xf] %v213_v4  ;;  %v217_v6 = vld [vmem:[%s189_s30 + $0x48] sm:$0xf] }
  0x16   : > { %216 = vst [vmem:[%s185_s5 + $0x14] sm:$0xf] %v215_v5  ;;  %v219_v7 = vld [vmem:[%s189_s30 + $0x54] sm:$0xf]  ;;  %218 = vst [vmem:[%s185_s5 + $0x18] sm:$0xf] %v217_v6 }
  0x17   : > { %220 = vst [vmem:[%s185_s5 + $0x1c] sm:$0xf] %v219_v7 }
  0x18 PF: > { %259 = sbr.rel (!%p1948_p3) target bundleno = 34 (0x22), region = 61  ;;  %s261_s6 = sand.u32 (%p1948_p3), 1, %s1873_s16  }
  0x19   : > { %s1690_s7 = smul.u32 (%p1948_p3), 96, %s1881_s18  ;;  %s1689_s8 = sshll.u32 (%p1948_p3), %s261_s6, 5 }
  0x1a   : > { %s263_s12 = scalar_lea.vmem (%p1948_p3), [#allocation3], %s1689_s8 }
  0x1b   : > { %s1589_s11 = scalar_lea.vmem (%p1948_p3), %s2309_s1, %s1690_s7 }
  0x1c   : > { %v1691_v8 = vld [vmem:[%s1589_s11 + $0x4] sm:$0xf] (%p1948_p3)  ;;  %v1692_v9 = vld [vmem:[%s1589_s11 + $0x10] sm:$0xf] (%p1948_p3)  ;;  %v1693_v10 = vld [vmem:[%s1589_s11 + $0x1c] sm:$0xf] (%p1948_p3) }
  0x1d   : > { %285 = vst [vmem:[%s263_s12] sm:$0xf] (%p1948_p3), %v1691_v8  ;;  %287 = vst [vmem:[%s263_s12 + $0x4] sm:$0xf] (%p1948_p3), %v1692_v9  ;;  %v1694_v11 = vld [vmem:[%s1589_s11 + $0x28] sm:$0xf] (%p1948_p3) }
  0x1e   : > { %289 = vst [vmem:[%s263_s12 + $0x8] sm:$0xf] (%p1948_p3), %v1693_v10  ;;  %v1695_v12 = vld [vmem:[%s1589_s11 + $0x34] sm:$0xf] (%p1948_p3)  ;;  %v1696_v13 = vld [vmem:[%s1589_s11 + $0x40] sm:$0xf] (%p1948_p3) }
  0x1f   : > { %291 = vst [vmem:[%s263_s12 + $0xc] sm:$0xf] %v1694_v11  ;;  %293 = vst [vmem:[%s263_s12 + $0x10] sm:$0xf] %v1695_v12  ;;  %v1697_v14 = vld [vmem:[%s1589_s11 + $0x4c] sm:$0xf] }
  0x20   : > { %295 = vst [vmem:[%s263_s12 + $0x14] sm:$0xf] %v1696_v13  ;;  %v1698_v15 = vld [vmem:[%s1589_s11 + $0x58] sm:$0xf]  ;;  %297 = vst [vmem:[%s263_s12 + $0x18] sm:$0xf] %v1697_v14 }
  0x21   : > { %299 = vst [vmem:[%s263_s12 + $0x1c] sm:$0xf] %v1698_v15 }
  0x22 PF: > { %338 = sbr.rel (!%p1948_p3) target bundleno = 44 (0x2c), region = 102  ;;  %s340_s13 = sand.u32 (%p1948_p3), 1, %s1873_s16  }
  0x23   : > { %s1700_s14 = smul.u32 (%p1948_p3), 96, %s1881_s18  ;;  %s1699_s22 = sshll.u32 (%p1948_p3), %s340_s13, 5 }
  0x24   : > { %s342_s27 = scalar_lea.vmem (%p1948_p3), [#allocation4], %s1699_s22 }
  0x25   : > { %s1596_s26 = scalar_lea.vmem (%p1948_p3), %s2310_s2, %s1700_s14 }
  0x26   : > { %v1701_v16 = vld [vmem:[%s1596_s26 + $0x8] sm:$0xf] (%p1948_p3)  ;;  %v1702_v17 = vld [vmem:[%s1596_s26 + $0x14] sm:$0xf] (%p1948_p3)  ;;  %v1703_v18 = vld [vmem:[%s1596_s26 + $0x20] sm:$0xf] (%p1948_p3) }
  0x27   : > { %364 = vst [vmem:[%s342_s27] sm:$0xf] (%p1948_p3), %v1701_v16  ;;  %366 = vst [vmem:[%s342_s27 + $0x4] sm:$0xf] (%p1948_p3), %v1702_v17  ;;  %v1704_v19 = vld [vmem:[%s1596_s26 + $0x2c] sm:$0xf] (%p1948_p3) }
  0x28   : > { %368 = vst [vmem:[%s342_s27 + $0x8] sm:$0xf] (%p1948_p3), %v1703_v18  ;;  %v1705_v20 = vld [vmem:[%s1596_s26 + $0x38] sm:$0xf] (%p1948_p3)  ;;  %v1706_v21 = vld [vmem:[%s1596_s26 + $0x44] sm:$0xf] (%p1948_p3) }
  0x29   : > { %370 = vst [vmem:[%s342_s27 + $0xc] sm:$0xf] %v1704_v19  ;;  %372 = vst [vmem:[%s342_s27 + $0x10] sm:$0xf] %v1705_v20  ;;  %v1707_v22 = vld [vmem:[%s1596_s26 + $0x50] sm:$0xf] }
  0x2a   : > { %374 = vst [vmem:[%s342_s27 + $0x14] sm:$0xf] %v1706_v21  ;;  %v1708_v23 = vld [vmem:[%s1596_s26 + $0x5c] sm:$0xf]  ;;  %376 = vst [vmem:[%s342_s27 + $0x18] sm:$0xf] %v1707_v22 }
  0x2b   : > { %378 = vst [vmem:[%s342_s27 + $0x1c] sm:$0xf] %v1708_v23 }
  0x2c PF: > { %p1709_p6 = scmp.ge.s32.totalorder %s1885_s19, 1  ;;  %p422_p7 = scmp.lt.s32.totalorder %s1885_s19, 3 }
  0x2e   : > { %p423_p8 = pnand %p1709_p6, %p422_p7 }
  0x2f   : > { %s429_s21 = sand.u32 (!%p423_p8), 1, %s1869_s15   ;;  %v1887_v24 = vmov (!%p423_p8), 0.0   ;;  %vm539_vm0 = vcmask (!%p423_p8), 1041409   ;;  %vm542_vm1 = vcmask (!%p423_p8), 1042434   ;;  %vm545_vm2 = vcmask (!%p423_p8), 1043459   ;;  %p481_p9 = scmp.lt.s32.totalorder (!%p423_p8), %s1877_s17, 1 }
  0x30   : > { %426 = sbr.rel (%p423_p8) target bundleno = 1154 (0x482), region = 147  ;;  %1745 = vmatprep.subr.mxu0 (!%p423_p8), %v1887_v24  ;;  %s1984_s28 = sshll.u32 (!%p423_p8), %s429_s21, 5  ;;  %vm548_vm3 = vcmask (!%p423_p8), 1044484   ;;  %1750 = vmatprep.subr.mxu1 (!%p423_p8), %v1887_v24  ;;  %vm551_vm4 = vcmask (!%p423_p8), 1045509   ;;  %vm554_vm5 = vcmask (!%p423_p8), 1046534   ;;  %vm557_vm6 = vcmask (!%p423_p8), 1047559  }
  0x31   : > { %s1988_s29 = scalar_lea.vmem (!%p423_p8), [#allocation3], %s1984_s28  ;;  %vm1888_vm7 = vmmov (!%p423_p8), 0   ;;  %vm581_vm8 = vcmask (!%p423_p8), 64512   ;;  %s2003_s15 = scalar_lea.vmem (!%p423_p8), [#allocation2], %s1984_s28  ;;  %vm1025_vm9 = vcmask (!%p423_p8), 130112   ;;  %vm1288_vm10 = vcmask (!%p423_p8), 195712  }
  0x32   : > { %v508_v25 = vld [vmem:[%s1988_s29] sm:$0x1] (!%p423_p8)  ;;  %v509_v26 = vld [vmem:[%s1988_s29 + $0x4] sm:$0x1] (!%p423_p8)  ;;  %v510_v27 = vld [vmem:[%s1988_s29 + $0x8] sm:$0x1] (!%p423_p8)  ;;  %1747 = vmatprep.mubr.msk.f32.mxu0 (!%p423_p8), %vm1888_vm7, %v1887_v24  ;;  %1752 = vmatprep.mubr.msk.f32.mxu1 (!%p423_p8), %vm1888_vm7, %v1887_v24 }
  0x33   : > { %v511_v28 = vld [vmem:[%s1988_s29 + $0xc] sm:$0x1] (!%p423_p8)  ;;  %v512_v29 = vld [vmem:[%s1988_s29 + $0x10] sm:$0x1] (!%p423_p8)  ;;  %v513_v30 = vld [vmem:[%s1988_s29 + $0x14] sm:$0x1] (!%p423_p8) }
  0x34   : > { %v514_v31 = vld [vmem:[%s1988_s29 + $0x18] sm:$0x1] (!%p423_p8)  ;;  %v515_v32 = vld [vmem:[%s1988_s29 + $0x1c] sm:$0x1] (!%p423_p8)  ;;  %v567_v33 = vrot.slane (!%p423_p8), %v509_v26, 7  ;;  %v569_v34 = vrot.slane (!%p423_p8), %v510_v27, 6 }
  0x35   : > { %v571_v35 = vrot.slane (!%p423_p8), %v511_v28, 5  ;;  %v573_v36 = vrot.slane (!%p423_p8), %v512_v29, 4  ;;  %v575_v37 = vrot.slane (!%p423_p8), %v513_v30, 3  ;;  %v492_v38 = vld [vmem:[%s2003_s15] sm:$0x1] (!%p423_p8)  ;;  %v577_v40 = vrot.slane (!%p423_p8), %v514_v31, 2 }
  0x36   : > { %v568_v39 = vsel (!%p423_p8), %vm539_vm0, %v567_v33, %v508_v25  ;;  %v579_v41 = vrot.slane (!%p423_p8), %v515_v32, 1  ;;  %v493_v42 = vld [vmem:[%s2003_s15 + $0x4] sm:$0x1] (!%p423_p8)  ;;  %v494_v43 = vld [vmem:[%s2003_s15 + $0x8] sm:$0x1] (!%p423_p8)  ;;  %s2048_s7 = scalar_lea.vmem (!%p423_p8), [#allocation4], %s1984_s28 }
  0x37   : > { %v570_v44 = vsel %vm542_vm1, %v569_v34, %v568_v39  ;;  %v495_v45 = vld [vmem:[%s2003_s15 + $0xc] sm:$0x1]  ;;  %v496_v46 = vld [vmem:[%s2003_s15 + $0x10] sm:$0x1]  ;;  %v497_v47 = vld [vmem:[%s2003_s15 + $0x14] sm:$0x1] }
  0x38   : > { %v572_v48 = vsel %vm545_vm2, %v571_v35, %v570_v44  ;;  %v498_v49 = vld [vmem:[%s2003_s15 + $0x18] sm:$0x1]  ;;  %v499_v50 = vld [vmem:[%s2003_s15 + $0x1c] sm:$0x1]  ;;  %v500_v51 = vmul.f32 0.35355338, %v492_v38 }
  0x39   : > { %v574_v52 = vsel %vm548_vm3, %v573_v36, %v572_v48  ;;  %v501_v53 = vmul.f32 0.35355338, %v493_v42  ;;  %v502_v54 = vmul.f32 0.35355338, %v494_v43  ;;  %v503_v55 = vmul.f32 0.35355338, %v495_v45 }
  0x3a   : > { %v576_v56 = vsel %vm551_vm4, %v575_v37, %v574_v52  ;;  %v504_v57 = vmul.f32 0.35355338, %v496_v46  ;;  %v505_v58 = vmul.f32 0.35355338, %v497_v47  ;;  %v506_v59 = vmul.f32 0.35355338, %v498_v49 }
  0x3b   : > { %v578_v60 = vsel %vm554_vm5, %v577_v40, %v576_v56  ;;  %v507_v61 = vmul.f32 0.35355338, %v499_v50  ;;  %v538_v62 = vrot.slane %v501_v53, 7  ;;  %v541_v63 = vrot.slane %v502_v54, 6  ;;  %s2321_s17 = smov (!%p481_p9, %s1877_s17), 1  ;;  %s1890_s12 = smov 16  }
  0x3c   : > { %v580_v0 = vsel %vm557_vm6, %v579_v41, %v578_v60  ;;  %v544_v1 = vrot.slane %v503_v55, 5  ;;  %v547_v2 = vrot.slane %v504_v57, 4  ;;  %v550_v4 = vrot.slane %v505_v58, 3  ;;  %s483_s6 = scalar_lea.vmem %s2311_s3, %s2321_s17  ;;  %v517_v18 = vld [vmem:[%s2048_s7 + $0x4] sm:$0x1]  ;;  %s1713_s8 = sshll.u32 %s2321_s17, 3 }
  0x3d   : > { %1746 = vmatpush3.xpose.msk.msra.mxu0 %vm581_vm8, %v580_v0  ;;  %v540_v3 = vsel %vm539_vm0, %v538_v62, %v500_v51  ;;  %v553_v6 = vrot.slane %v506_v59, 2  ;;  %v556_v8 = vrot.slane %v507_v61, 1  ;;  %v2040_v13 = vld [vmem:[%s483_s6] ss:$0 sm:$0xff]  ;;  %v518_v19 = vld [vmem:[%s2048_s7 + $0x8] sm:$0x1]  ;;  %s2285_s11 = scalar_lea.vmem %s2312_s4, %s1713_s8 }
  0x3e   : > { %v543_v5 = vsel %vm542_vm1, %v541_v63, %v540_v3  ;;  %1760 = vmatprep.subr.mxu0 %v1887_v24  ;;  %v673_v20 = vrot.slane %v517_v18, 7  ;;  %v516_v21 = vld [vmem:[%s2048_s7] sm:$0x1]  ;;  %v519_v22 = vld [vmem:[%s2048_s7 + $0xc] sm:$0x1]  ;;  %v675_v23 = vrot.slane %v518_v19, 6 }
  0x3f   : > { %v546_v7 = vsel %vm545_vm2, %v544_v1, %v543_v5  ;;  %v520_v25 = vld [vmem:[%s2048_s7 + $0x10] sm:$0x1]  ;;  %v677_v27 = vrot.slane %v519_v22, 5  ;;  %v521_v28 = vld [vmem:[%s2048_s7 + $0x14] sm:$0x1]  ;;  %s1889_s17 = smov 8  }
  0x40   : > { %v549_v9 = vsel %vm548_vm3, %v547_v2, %v546_v7  ;;  %v674_v26 = vsel %vm539_vm0, %v673_v20, %v516_v21  ;;  %v679_v30 = vrot.slane %v520_v25, 4  ;;  %v522_v31 = vld [vmem:[%s2048_s7 + $0x18] sm:$0x1]  ;;  %v523_v32 = vld [vmem:[%s2048_s7 + $0x1c] sm:$0x1]  ;;  %v681_v34 = vrot.slane %v521_v28, 3 }
  0x41   : > { %v552_v10 = vsel %vm551_vm4, %v550_v4, %v549_v9  ;;  %v676_v29 = vsel %vm542_vm1, %v675_v23, %v674_v26  ;;  %v683_v36 = vrot.slane %v522_v31, 2  ;;  %v685_v37 = vrot.slane %v523_v32, 1  ;;  %v781_v41 = vld [vmem:[%s1988_s29 + $0x5] sm:$0x1]  ;;  %v782_v42 = vld [vmem:[%s1988_s29 + $0x9] sm:$0x1] }
  0x42   : > { %v555_v11 = vsel %vm554_vm5, %v553_v6, %v552_v10  ;;  %v678_v33 = vsel %vm545_vm2, %v677_v27, %v676_v29  ;;  %v783_v43 = vld [vmem:[%s1988_s29 + $0xd] sm:$0x1]  ;;  %v784_v44 = vld [vmem:[%s1988_s29 + $0x11] sm:$0x1]  ;;  %v2071_v45 = vld [vmem:[%s1988_s29 + $0x15] sm:$0x1] }
  0x43   : > { %v558_v12 = vsel %vm557_vm6, %v556_v8, %v555_v11  ;;  %v680_v35 = vsel %vm548_vm3, %v679_v30, %v678_v33  ;;  %v780_v46 = vld [vmem:[%s1988_s29 + $0x1] sm:$0x1]  ;;  %v826_v47 = vrot.slane %v781_v41, 7  ;;  %v765_v48 = vld [vmem:[%s2003_s15 + $0x5] sm:$0x1]  ;;  %v828_v49 = vrot.slane %v782_v42, 6 }
  0x44   : > { %1748 = vmatmul.mubr.msk.f32.vlgmr.msra.gmra.mrb[0].mxu0 %vm581_vm8, %v558_v12  ;;  %v682_v38 = vsel %vm551_vm4, %v681_v34, %v680_v35  ;;  %v830_v50 = vrot.slane %v783_v43, 5  ;;  %v764_v51 = vld [vmem:[%s2003_s15 + $0x1] sm:$0x1]  ;;  %v766_v52 = vld [vmem:[%s2003_s15 + $0x9] sm:$0x1]  ;;  %v832_v54 = vrot.slane %v784_v44, 4 }
  0x45   : > { %1762 = vmatprep.mubr.msk.f32.mxu0 %vm1888_vm7, %v1887_v24  ;;  %v684_v39 = vsel %vm554_vm5, %v683_v36, %v682_v38  ;;  %v2078_v53 = vld [vmem:[%s1988_s29 + $0x19] sm:$0x1]  ;;  %v834_v55 = vrot.slane %v2071_v45, 3  ;;  %v767_v56 = vld [vmem:[%s2003_s15 + $0xd] sm:$0x1]  ;;  %v827_v0 = vsel %vm539_vm0, %v826_v47, %v780_v46  ;;  %s1891_s13 = smov 24  }
  0x46   : > { %v686_v40 = vsel %vm557_vm6, %v685_v37, %v684_v39  ;;  %v2083_v57 = vld [vmem:[%s1988_s29 + $0x1d] sm:$0x1]  ;;  %v768_v58 = vld [vmem:[%s2003_s15 + $0x11] sm:$0x1]  ;;  %v769_v59 = vld [vmem:[%s2003_s15 + $0x15] sm:$0x1]  ;;  %v829_v11 = vsel %vm542_vm1, %v828_v49, %v827_v0 }
  0x47   : > { %1751 = vmatpush3.msra.mxu1 %v686_v40  ;;  %v773_v60 = vmul.f32 0.35355338, %v765_v48  ;;  %v770_v61 = vld [vmem:[%s2003_s15 + $0x19] sm:$0x1]  ;;  %v771_v62 = vld [vmem:[%s2003_s15 + $0x1d] sm:$0x1]  ;;  %v831_v27 = vsel %vm545_vm2, %v830_v50, %v829_v11 }
  0x48   : > { %1755 = vmatprep.subr.mxu1 %v1887_v24  ;;  %v774_v63 = vmul.f32 0.35355338, %v766_v52  ;;  %v772_v1 = vmul.f32 0.35355338, %v764_v51  ;;  %v775_v2 = vmul.f32 0.35355338, %v767_v56  ;;  %v833_v41 = vsel %vm548_vm3, %v832_v54, %v831_v27 }
  0x49   : > { %v1028_v3 = vld [vmem:[%s2003_s15 + $0x6] sm:$0x1]  ;;  %v2091_v4 = vmul.f32 0.35355338, %v768_v58  ;;  %v2093_v5 = vmul.f32 0.35355338, %v769_v59 }
  0x4a   : > { %v1044_v6 = vld [vmem:[%s1988_s29 + $0x6] sm:$0x1]  ;;  %v836_v7 = vrot.slane %v2078_v53, 2  ;;  %v2097_v8 = vmul.f32 0.35355338, %v770_v61  ;;  %v804_v10 = vrot.slane %v773_v60, 7 }
  0x4b   : > { %v2099_v9 = vmul.f32 0.35355338, %v771_v62  ;;  %v838_v12 = vrot.slane %v2083_v57, 1  ;;  %v808_v18 = vrot.slane %v775_v2, 5  ;;  %v1045_v19 = vld [vmem:[%s1988_s29 + $0xa] sm:$0x1] }
  0x4c   : > { %v1089_v20 = vrot.slane %v1044_v6, 7  ;;  %v1027_v21 = vld [vmem:[%s2003_s15 + $0x2] sm:$0x1]  ;;  %v810_v22 = vrot.slane %v2091_v4, 4  ;;  %v812_v23 = vrot.slane %v2093_v5, 3  ;;  %v805_v28 = vsel %vm539_vm0, %v804_v10, %v772_v1 }
  0x4d   : > { %v1043_v25 = vld [vmem:[%s1988_s29 + $0x2] sm:$0x1]  ;;  %v1291_v26 = vld [vmem:[%s2003_s15 + $0x7] sm:$0x1]  ;;  %v1046_v29 = vld [vmem:[%s1988_s29 + $0xe] sm:$0x1] }
  0x4e   : > { %v1307_v31 = vld [vmem:[%s1988_s29 + $0x7] sm:$0x1]  ;;  %v1091_v32 = vrot.slane %v1045_v19, 6  ;;  %v1030_v33 = vld [vmem:[%s2003_s15 + $0xe] sm:$0x1]  ;;  %v1090_v36 = vsel %vm539_vm0, %v1089_v20, %v1043_v25  ;;  %v814_v43 = vrot.slane %v2097_v8, 2 }
  0x4f   : > { %v1035_v34 = vmul.f32 0.35355338, %v1027_v21  ;;  %v1031_v37 = vld [vmem:[%s2003_s15 + $0x12] sm:$0x1]  ;;  %v1292_v38 = vld [vmem:[%s2003_s15 + $0xb] sm:$0x1] }
  0x50   : > { %v1299_v39 = vmul.f32 0.35355338, %v1291_v26  ;;  %v1047_v44 = vld [vmem:[%s1988_s29 + $0x12] sm:$0x1]  ;;  %v1308_v46 = vld [vmem:[%s1988_s29 + $0xb] sm:$0x1]  ;;  %v1092_v58 = vsel %vm542_vm1, %v1091_v32, %v1090_v36 }
  0x51   : > { %v1352_v47 = vrot.slane %v1307_v31, 7  ;;  %v1290_v48 = vld [vmem:[%s2003_s15 + $0x3] sm:$0x1]  ;;  %v1093_v50 = vrot.slane %v1046_v29, 5  ;;  %v1038_v51 = vmul.f32 0.35355338, %v1030_v33 }
  0x52   : > { %v1306_v56 = vld [vmem:[%s1988_s29 + $0x3] sm:$0x1]  ;;  %v1309_v59 = vld [vmem:[%s1988_s29 + $0xf] sm:$0x1]  ;;  %v1300_v61 = vmul.f32 0.35355338, %v1292_v38 }
  0x53   : > { %v1293_v60 = vld [vmem:[%s2003_s15 + $0xf] sm:$0x1]  ;;  %v1298_v0 = vmul.f32 0.35355338, %v1290_v48  ;;  %v1330_v1 = vrot.slane %v1299_v39, 7  ;;  %v1353_v10 = vsel %vm539_vm0, %v1352_v47, %v1306_v56  ;;  %v1095_v11 = vrot.slane %v1047_v44, 4 }
  0x54   : > { %v1032_v4 = vld [vmem:[%s2003_s15 + $0x16] sm:$0x1]  ;;  %v1039_v6 = vmul.f32 0.35355338, %v1031_v37  ;;  %v1094_v19 = vsel %vm545_vm2, %v1093_v50, %v1092_v58  ;;  %v1332_v20 = vrot.slane %v1300_v61, 6  ;;  %v816_v56 = vrot.slane %v2099_v9, 1 }
  0x55   : > { %v1049_v25 = vld [vmem:[%s1988_s29 + $0x1a] sm:$0x1]  ;;  %v1040_v27 = vmul.f32 0.35355338, %v1032_v4  ;;  %v1331_v29 = vsel %vm539_vm0, %v1330_v1, %v1298_v0  ;;  %v1295_v33 = vld [vmem:[%s2003_s15 + $0x17] sm:$0x1]  ;;  %v1096_v53 = vsel %vm548_vm3, %v1095_v11, %v1094_v19 }
  0x56   : > { %v1033_v26 = vld [vmem:[%s2003_s15 + $0x1a] sm:$0x1]  ;;  %v1073_v32 = vrot.slane %v1039_v6, 4  ;;  %v1050_v39 = vld [vmem:[%s1988_s29 + $0x1e] sm:$0x1]  ;;  %vm1551_vm11 = vcmask 261312  }
  0x57   : > { %v1075_v47 = vrot.slane %v1040_v27, 3  ;;  %v1296_v48 = vld [vmem:[%s2003_s15 + $0x1b] sm:$0x1]  ;;  %v1297_v61 = vld [vmem:[%s2003_s15 + $0x1f] sm:$0x1] }
  0x58   : > { %v1312_v50 = vld [vmem:[%s1988_s29 + $0x1b] sm:$0x1]  ;;  %v1313_v9 = vld [vmem:[%s1988_s29 + $0x1f] sm:$0x1]  ;;  %v1305_v6 = vmul.f32 0.35355338, %v1297_v61 }
  0x59   : > { %v1051_v61 = vld [vmem:[%s2048_s7 + $0x2] sm:$0x1] }
 0x117   : > { %v652_v14 = vpop.f32.mrb[0].mxu0 }
 0x118   : > { %v2043_v15 = vadd.f32 %v2040_v13, %v652_v14  ;;  %v1749_v16 = vpop.f32.mrb[1].mxu0  ;;  %v806_v14 = vrot.slane %v774_v63, 6  ;;  %v1354_v63 = vrot.slane %v1308_v46, 6  ;;  %v1099_v46 = vrot.slane %v1049_v25, 2 }
 0x119   : > { %v1029_v16 = vld [vmem:[%s2003_s15 + $0xa] sm:$0x1] }
 0x11a   : > { %v656_v17 = vsel %vm581_vm8, %v2043_v15, -inf  ;;  %v1037_v30 = vmul.f32 0.35355338, %v1029_v16  ;;  %v807_v42 = vsel %vm542_vm1, %v806_v14, %v805_v28  ;;  %v1071_v14 = vrot.slane %v1038_v51, 5  ;;  %v1294_v16 = vld [vmem:[%s2003_s15 + $0x13] sm:$0x1] }
 0x11b   : > { %657 = vmax.xlane.f32.xlu0 %v656_v17  ;;  %v1036_v17 = vmul.f32 0.35355338, %v1028_v3  ;;  %v809_v2 = vsel %vm545_vm2, %v808_v18, %v807_v42  ;;  %v1048_v3 = vld [vmem:[%s1988_s29 + $0x16] sm:$0x1]  ;;  %v1356_v18 = vrot.slane %v1309_v59, 5  ;;  %v1355_v28 = vsel %vm542_vm1, %v1354_v63, %v1353_v10 }
 0x11c   : > { %v1069_v52 = vrot.slane %v1037_v30, 6  ;;  %v811_v30 = vsel %vm548_vm3, %v810_v22, %v809_v2  ;;  %v1097_v31 = vrot.slane %v1048_v3, 3  ;;  %v1041_v22 = vmul.f32 0.35355338, %v1033_v26 }
 0x11d   : > { %v1067_v35 = vrot.slane %v1036_v17, 7  ;;  %v1301_v17 = vmul.f32 0.35355338, %v1293_v60  ;;  %v1333_v42 = vsel %vm542_vm1, %v1332_v20, %v1331_v29  ;;  %v813_v44 = vsel %vm551_vm4, %v812_v23, %v811_v30 }
 0x11e   : > { %v1098_v57 = vsel %vm551_vm4, %v1097_v31, %v1096_v53  ;;  %v1101_v59 = vrot.slane %v1050_v39, 1  ;;  %v1077_v60 = vrot.slane %v1041_v22, 2  ;;  %v791_v22 = vld [vmem:[%s2048_s7 + $0xd] sm:$0x1] }
 0x11f   : > { %v1068_v54 = vsel %vm539_vm0, %v1067_v35, %v1035_v34  ;;  %v1302_v34 = vmul.f32 0.35355338, %v1294_v16  ;;  %v1311_v35 = vld [vmem:[%s1988_s29 + $0x17] sm:$0x1]  ;;  %v1334_v37 = vrot.slane %v1301_v17, 5  ;;  %v1100_v0 = vsel %vm554_vm5, %v1099_v46, %v1098_v57 }
 0x120   : > { %v1070_v45 = vsel %vm542_vm1, %v1069_v52, %v1068_v54  ;;  %v1360_v51 = vrot.slane %v1311_v35, 3  ;;  %v815_v54 = vsel %vm554_vm5, %v814_v43, %v813_v44  ;;  %v1102_v10 = vsel %vm557_vm6, %v1101_v59, %v1100_v0  ;;  %v1053_v59 = vld [vmem:[%s2048_s7 + $0xa] sm:$0x1]  ;;  %v1054_v0 = vld [vmem:[%s2048_s7 + $0xe] sm:$0x1] }
 0x121   : > { %v1336_v52 = vrot.slane %v1302_v34, 4  ;;  %v1335_v23 = vsel %vm545_vm2, %v1334_v37, %v1333_v42  ;;  %v817_v3 = vsel %vm557_vm6, %v816_v56, %v815_v54  ;;  %v789_v37 = vld [vmem:[%s2048_s7 + $0x5] sm:$0x1]  ;;  %v792_v42 = vld [vmem:[%s2048_s7 + $0x11] sm:$0x1]  ;;  %v935_v46 = vrot.slane %v791_v22, 5 }
 0x122   : > { %v931_v39 = vrot.slane %v789_v37, 7  ;;  %v1052_v54 = vld [vmem:[%s2048_s7 + $0x6] sm:$0x1] }
 0x123   : > { %v1337_v43 = vsel %vm548_vm3, %v1336_v52, %v1335_v23 }
 0x1a8   : > { %v658_v40 = vpop.xlane.xlu0 %657 }
 0x1a9   : > { %v659_v49 = vsub.f32 %v2043_v15, %v658_v40  ;;  %v835_v15 = vsel %vm551_vm4, %v834_v55, %v833_v41  ;;  %v1310_v55 = vld [vmem:[%s1988_s29 + $0x13] sm:$0x1]  ;;  %v1034_v40 = vld [vmem:[%s2003_s15 + $0x1e] sm:$0x1]  ;;  %v1357_v41 = vsel %vm545_vm2, %v1356_v18, %v1355_v28 }
 0x1aa   : > { %v837_v21 = vsel %vm554_vm5, %v836_v7, %v835_v15  ;;  %v1072_v7 = vsel %vm545_vm2, %v1071_v14, %v1070_v45  ;;  %v1358_v36 = vrot.slane %v1310_v55, 4  ;;  %v1042_v58 = vmul.f32 0.35355338, %v1034_v40  ;;  %v788_v40 = vld [vmem:[%s2048_s7 + $0x1] sm:$0x1] }
 0x1ab   : > { %v660_v62 = vmul.f32 1.442695, %v659_v49  ;;  %v839_v38 = vsel %vm557_vm6, %v838_v12, %v837_v21  ;;  %v1303_v49 = vmul.f32 0.35355338, %v1295_v33  ;;  %v1074_v12 = vsel %vm548_vm3, %v1073_v32, %v1072_v7 }
 0x1ac   : > { %v1359_v5 = vsel %vm548_vm3, %v1358_v36, %v1357_v41  ;;  %v1076_v1 = vsel %vm551_vm4, %v1075_v47, %v1074_v12  ;;  %v1362_v15 = vrot.slane %v1312_v50, 2  ;;  %v1079_v4 = vrot.slane %v1042_v58, 1  ;;  %v795_v50 = vld [vmem:[%s2048_s7 + $0x1d] sm:$0x1] }
 0x1ad   : > { %1831 = vpow2.f32 %v660_v62  ;;  %v1304_v62 = vmul.f32 0.35355338, %v1296_v48  ;;  %v1338_v2 = vrot.slane %v1303_v49, 3  ;;  %v1361_v8 = vsel %vm551_vm4, %v1360_v51, %v1359_v5  ;;  %v794_v49 = vld [vmem:[%s2048_s7 + $0x19] sm:$0x1] }
 0x1ae   : > { %v1078_v11 = vsel %vm554_vm5, %v1077_v60, %v1076_v1  ;;  %v1364_v14 = vrot.slane %v1313_v9, 1  ;;  %v1363_v17 = vsel %vm554_vm5, %v1362_v15, %v1361_v8  ;;  %v1342_v55 = vrot.slane %v1305_v6, 1  ;;  %v1316_v15 = vld [vmem:[%s2048_s7 + $0xb] sm:$0x1]  ;;  %v1314_v8 = vld [vmem:[%s2048_s7 + $0x3] sm:$0x1] }
 0x1af   : > { %v1340_v16 = vrot.slane %v1304_v62, 2  ;;  %v1339_v19 = vsel %vm551_vm4, %v1338_v2, %v1337_v43  ;;  %v1080_v45 = vsel %vm557_vm6, %v1079_v4, %v1078_v11  ;;  %v932_v44 = vsel %vm539_vm0, %v931_v39, %v788_v40  ;;  %v1315_v62 = vld [vmem:[%s2048_s7 + $0x7] sm:$0x1]  ;;  %v1055_v43 = vld [vmem:[%s2048_s7 + $0x12] sm:$0x1] }
 0x1b0   : > { %v1365_v18 = vsel %vm557_vm6, %v1364_v14, %v1363_v17  ;;  %v937_v48 = vrot.slane %v792_v42, 4  ;;  %v941_v52 = vrot.slane %v794_v49, 2  ;;  %v943_v58 = vrot.slane %v795_v50, 1  ;;  %v1317_v6 = vld [vmem:[%s2048_s7 + $0xf] sm:$0x1] }
 0x1b1   : > { %v1341_v20 = vsel %vm554_vm5, %v1340_v16, %v1339_v19  ;;  %v1194_v60 = vrot.slane %v1052_v54, 7  ;;  %v1196_v1 = vrot.slane %v1053_v59, 6  ;;  %v1457_v2 = vrot.slane %v1315_v62, 7  ;;  %v1056_v17 = vld [vmem:[%s2048_s7 + $0x16] sm:$0x1] }
 0x1b2   : > { %v1343_v21 = vsel %vm557_vm6, %v1342_v55, %v1341_v20  ;;  %v1200_v19 = vrot.slane %v1055_v43, 4  ;;  %v1318_v55 = vld [vmem:[%s2048_s7 + $0x13] sm:$0x1]  ;;  %v1320_v39 = vld [vmem:[%s2048_s7 + $0x1b] sm:$0x1] }
 0x1b3   : > { %v1195_v9 = vsel %vm539_vm0, %v1194_v60, %v1051_v61  ;;  %v1458_v14 = vsel %vm539_vm0, %v1457_v2, %v1314_v8 }
 0x1b4   : > { %v1197_v4 = vsel %vm542_vm1, %v1196_v1, %v1195_v9 }
 0x1b7   : > { %v2174_v63 = vpop.eup %1831 }
 0x1b8   : > { %1753 = vmatmul.mubr.msk.f32.vlgmr.msra.gmra.mrb[0].mxu1 %vm581_vm8, %v2174_v63 }
 0x1b9   : > { %1756 = vmatpush3.xpose.msk.msra.mxu1 %vm581_vm8, %v839_v38  ;;  %1757 = vmatprep.mubr.msk.f32.mxu1 %vm1888_vm7, %v1887_v24  ;;  %v790_v38 = vld [vmem:[%s2048_s7 + $0x9] sm:$0x1] }
 0x1ba   : > { %1765 = vmatprep.subr.mxu1 %v1887_v24  ;;  %v933_v41 = vrot.slane %v790_v38, 6 }
 0x1bc   : > { %1758 = vmatmul.mubr.msk.f32.vlgmr.msra.gmra.mrb[2].mxu1 %vm581_vm8, %v817_v3  ;;  %v934_v47 = vsel %vm542_vm1, %v933_v41, %v932_v44  ;;  %v1198_v3 = vrot.slane %v1054_v0, 5 }
 0x1bd   : > { %1766 = vmatpush3.xpose.msk.msra.mxu1 %vm581_vm8, %v1102_v10  ;;  %1767 = vmatprep.mubr.msk.f32.mxu1 %vm1888_vm7, %v1887_v24  ;;  %v936_v57 = vsel %vm545_vm2, %v935_v46, %v934_v47  ;;  %v1459_v10 = vrot.slane %v1316_v15, 6  ;;  %v1321_v46 = vld [vmem:[%s2048_s7 + $0x1f] sm:$0x1] }
 0x1be   : > { %1775 = vmatprep.subr.mxu1 %v1887_v24  ;;  %v938_v51 = vsel %vm548_vm3, %v937_v48, %v936_v57  ;;  %v1469_v49 = vrot.slane %v1321_v46, 1 }
 0x1c0   : > { %1768 = vmatmul.mubr.msk.f32.vlgmr.msra.gmra.mrb[4].mxu1 %vm581_vm8, %v1080_v45  ;;  %v1199_v45 = vsel %vm545_vm2, %v1198_v3, %v1197_v4 }
 0x1c1   : > { %1776 = vmatpush3.xpose.msk.msra.mxu1 %vm581_vm8, %v1365_v18  ;;  %1777 = vmatprep.mubr.msk.f32.mxu1 %vm1888_vm7, %v1887_v24  ;;  %v1461_v18 = vrot.slane %v1317_v6, 5 }
 0x1c4   : > { %1778 = vmatmul.mubr.msk.f32.vlgmr.msra.gmra.mrb[6].mxu1 %vm581_vm8, %v1343_v21  ;;  %v1460_v21 = vsel %vm542_vm1, %v1459_v10, %v1458_v14 }
 0x28b   : > { %v2206_v25 = vpop.f32.mrb[0].mxu1 }
 0x28c   : > { %v1754_v26 = vpop.f32.mrb[1].mxu1 }
 0x28f   : > { %v910_v27 = vpop.f32.mrb[2].mxu1 }
 0x290   : > { %v911_v28 = vadd.f32 %v2040_v13, %v910_v27  ;;  %v1759_v29 = vpop.f32.mrb[3].mxu1  ;;  %v1057_v27 = vld [vmem:[%s2048_s7 + $0x1a] sm:$0x1] }
 0x291   : > { %v1202_v29 = vrot.slane %v1056_v17, 3 }
 0x292   : > { %v914_v30 = vsel %vm581_vm8, %v911_v28, -inf }
 0x293   : > { %915 = vmax.xlane.f32.xlu0 %v914_v30  ;;  %v1173_v31 = vpop.f32.mrb[4].mxu1 }
 0x294   : > { %v2211_v32 = vadd.f32 %v2040_v13, %v1173_v31  ;;  %v1769_v33 = vpop.f32.mrb[5].mxu1  ;;  %v1201_v31 = vsel %vm548_vm3, %v1200_v19, %v1199_v45 }
 0x295   : > { %v1463_v33 = vrot.slane %v1318_v55, 4  ;;  %v1203_v38 = vsel %vm551_vm4, %v1202_v29, %v1201_v31 }
 0x296   : > { %v1177_v34 = vsel %vm581_vm8, %v2211_v32, -inf }
 0x297   : > { %1178 = vmax.xlane.f32.xlu1 %v1177_v34  ;;  %v1436_v53 = vpop.f32.mrb[6].mxu1  ;;  %v1462_v34 = vsel %vm545_vm2, %v1461_v18, %v1460_v21 }
 0x298   : > { %v2216_v7 = vadd.f32 %v2040_v13, %v1436_v53  ;;  %v1779_v35 = vpop.f32.mrb[7].mxu1  ;;  %v793_v13 = vld [vmem:[%s2048_s7 + $0x15] sm:$0x1] }
 0x299   : > { %v939_v12 = vrot.slane %v793_v13, 3  ;;  %v1058_v35 = vld [vmem:[%s2048_s7 + $0x1e] sm:$0x1]  ;;  %v1467_v13 = vrot.slane %v1320_v39, 2 }
 0x29a   : > { %v1440_v36 = vsel %vm581_vm8, %v2216_v7, -inf  ;;  %v1206_v41 = vrot.slane %v1058_v35, 1 }
 0x29b   : > { %1441 = vmax.xlane.f32.xlu1 %v1440_v36  ;;  %v940_v56 = vsel %vm551_vm4, %v939_v12, %v938_v51  ;;  %v1204_v36 = vrot.slane %v1057_v27, 2 }
 0x29c   : > { %v942_v5 = vsel %vm554_vm5, %v941_v52, %v940_v56 }
 0x29d   : > { %v944_v23 = vsel %vm557_vm6, %v943_v58, %v942_v5  ;;  %v1205_v44 = vsel %vm554_vm5, %v1204_v36, %v1203_v38  ;;  %v662_v5 = vsel %vm581_vm8, %v2174_v63, 0.0 }
 0x29e   : > { %1761 = vmatpush3.msra.mxu0 %v944_v23  ;;  %v1207_v48 = vsel %vm557_vm6, %v1206_v41, %v1205_v44 }
 0x29f   : > { %1770 = vmatprep.subr.mxu0 %v1887_v24 }
 0x320   : > { %v916_v11 = vpop.xlane.xlu0 %915 }
 0x321   : > { %v917_v16 = vsub.f32 %v911_v28, %v916_v11  ;;  %v1319_v28 = vld [vmem:[%s2048_s7 + $0x17] sm:$0x1] }
 0x322   : > { %v1465_v40 = vrot.slane %v1319_v28, 3 }
 0x323   : > { %v918_v20 = vmul.f32 1.442695, %v917_v16 }
 0x324   : > { %v1179_v26 = vpop.xlane.xlu1 %1178 }
 0x325   : > { %1833 = vpow2.f32 %v918_v20  ;;  %v1180_v30 = vsub.f32 %v2211_v32, %v1179_v26  ;;  %v1464_v32 = vsel %vm548_vm3, %v1463_v33, %v1462_v34 }
 0x326   : > { %v1466_v47 = vsel %vm551_vm4, %v1465_v40, %v1464_v32 }
 0x327   : > { %v1181_v53 = vmul.f32 1.442695, %v1180_v30  ;;  %v1468_v12 = vsel %vm554_vm5, %v1467_v13, %v1466_v47 }
 0x328   : > { %v1442_v37 = vpop.xlane.xlu1 %1441  ;;  %v1470_v50 = vsel %vm557_vm6, %v1469_v49, %v1468_v12 }
 0x329   : > { %1835 = vpow2.f32 %v1181_v53  ;;  %v1443_v22 = vsub.f32 %v2216_v7, %v1442_v37 }
 0x32b   : > { %v1444_v42 = vmul.f32 1.442695, %v1443_v22 }
 0x32d   : > { %1837 = vpow2.f32 %v1444_v42 }
 0x32f   : > { %v1834_v57 = vpop.eup %1833 }
 0x330   : > { %1763 = vmatmul.mubr.msk.f32.vlgmr.msra.gmra.mrb[2].mxu0 %vm581_vm8, %v1834_v57  ;;  %v920_v7 = vsel %vm581_vm8, %v1834_v57, 0.0 }
 0x331   : > { %1771 = vmatpush3.msra.mxu0 %v1207_v48  ;;  %921 = vadd.xlane.f32.xlu0 %v920_v7 }
 0x332   : > { %1772 = vmatprep.mubr.msk.f32.mxu0 %vm1888_vm7, %v1887_v24  ;;  %1780 = vmatprep.subr.mxu0 %v1887_v24 }
 0x333   : > { %v1836_v51 = vpop.eup %1835 }
 0x334   : > { %1773 = vmatmul.mubr.msk.f32.vlgmr.msra.gmra.mrb[4].mxu0 %vm581_vm8, %v1836_v51  ;;  %v1183_v52 = vsel %vm581_vm8, %v1836_v51, 0.0 }
 0x335   : > { %1781 = vmatpush3.msra.mxu0 %v1470_v50  ;;  %1184 = vadd.xlane.f32.xlu1 %v1183_v52 }
 0x336   : > { %1782 = vmatprep.mubr.msk.f32.mxu0 %vm1888_vm7, %v1887_v24 }
 0x337   : > { %v1838_v56 = vpop.eup %1837 }
 0x338   : > { %1783 = vmatmul.mubr.msk.f32.vlgmr.msra.gmra.mrb[6].mxu0 %vm581_vm8, %v1838_v56  ;;  %v1446_v58 = vsel %vm581_vm8, %v1838_v56, 0.0 }
 0x339   : > { %1447 = vadd.xlane.f32.xlu0 %v1446_v58  ;;  %663 = vadd.xlane.f32.xlu1 %v662_v5 }
 0x3be   : > { %v922_v60 = vpop.xlane.xlu0 %921 }
 0x3c2   : > { %v1185_v23 = vpop.xlane.xlu1 %1184 }
 0x3c6   : > { %v664_v54 = vpop.xlane.xlu1 %663  ;;  %v1448_v63 = vpop.xlane.xlu0 %1447 }
 0x3c7   : > { %1839 = vrcp.f32 %v664_v54 }
 0x3c8   : > { %1841 = vrcp.f32 %v922_v60 }
 0x3c9   : > { %1843 = vrcp.f32 %v1185_v23 }
 0x3ca   : > { %1845 = vrcp.f32 %v1448_v63 }
 0x3d1   : > { %v1840_v59 = vpop.eup %1839 }
 0x3d2   : > { %v762_v24 = vmul.f32 %v1840_v59, %v2206_v25  ;;  %v1842_v61 = vpop.eup %1841 }
 0x3d3   : > { %v1844_v9 = vpop.eup %1843 }
 0x3d4   : > { %763 = vst.msk [vmem:[%s2285_s11] sm:$0xff] %vm581_vm8, %v762_v24  ;;  %v1846_v25 = vpop.eup %1845 }
 0x403   : > { %v1015_v62 = vpop.f32.mrb[2].mxu0 }
 0x404   : > { %v1020_v0 = vmul.f32 %v1842_v61, %v1015_v62  ;;  %v1764_v1 = vpop.f32.mrb[3].mxu0 }
 0x406   : > { %1022 = vrot.lane.b32.xlu0 %v1020_v0, %s1889_s17 }
 0x407   : > { %v1278_v15 = vpop.f32.mrb[4].mxu0 }
 0x408   : > { %v1283_v2 = vmul.f32 %v1844_v9, %v1278_v15  ;;  %v1774_v8 = vpop.f32.mrb[5].mxu0 }
 0x40a   : > { %1285 = vrot.lane.b32.xlu1 %v1283_v2, %s1890_s12 }
 0x40b   : > { %v1541_v43 = vpop.f32.mrb[6].mxu0 }
 0x40c   : > { %v1546_v3 = vmul.f32 %v1846_v25, %v1541_v43  ;;  %v1784_v4 = vpop.f32.mrb[7].mxu0 }
 0x40e   : > { %1548 = vrot.lane.b32.xlu1 %v1546_v3, %s1891_s13 }
 0x478   : > { %v1023_v6 = vpop.permute.xlu0 %1022 }
 0x479   : > { %1026 = vst.msk [vmem:[%s2285_s11] sm:$0xff] %vm1025_vm9, %v1023_v6 }
 0x47c   : > { %v1286_v10 = vpop.permute.xlu1 %1285 }
 0x47d   : > { %1289 = vst.msk [vmem:[%s2285_s11] sm:$0xff] %vm1288_vm10, %v1286_v10 }
 0x480   : > { %v1549_v11 = vpop.permute.xlu1 %1548 }
 0x481   : > { %1552 = vst.msk [vmem:[%s2285_s11] sm:$0xff] %vm1551_vm11, %v1549_v11 }
 0x482 PF: > { %s14_s19 = sadd.s32 1, %s1885_s19   ;;  %s2314_s15 = smov %s1873_s16 }
 0x483   : > { %p11_p10 = scmp.ge.s32.totalorder %s14_s19, 4   ;;  %s2315_s16 = smov %s1956_s24 }
 0x484   : > { %s2316_s17 = smov %s1881_s18  ;;  %s2317_s18 = smov %s2319_s20 }
 0x485   :  { %13 = sbr.rel (!%p11_p10) target bundleno = 3 (0x3), region = 213 }

// kernel: encoder_forward.9
= control target key start
LH: loop header
LB: loop body
LE: loop exit
PB: predicated region body
PF: predicated region fallthrough
CT: control target
= control target key end

     0   :  { %vm43_vm0 = vcmask 523264   ;;  %vm28_vm1 = vcmask 261120   ;;  %v293_v5 = vmov 0.0   ;;  %s401_s0 = inlined_call_operand.vmem [shape: f32[16,64], index: 0, kind: input, shape index: {}]   ;;  %s402_s1 = inlined_call_operand.vmem [shape: f32[64,32], index: 1, kind: input, shape index: {}]   ;;  %s403_s2 = inlined_call_operand.vmem [shape: f32[1,32], index: 2, kind: input, shape index: {}]   ;;  %s404_s3 = inlined_call_operand.vmem [shape: f32[16,32], index: 3, kind: input, shape index: {}]   ;;  %s405_s4 = inlined_call_operand.vmem [shape: f32[1,32], index: 4, kind: input, shape index: {}]   ;;  %s406_s5 = inlined_call_operand.vmem [shape: f32[1,32], index: 5, kind: input, shape index: {}]   ;;  %s407_s6 = inlined_call_operand.hbm [shape: f32[16,32], index: 6, kind: output, shape index: {}]  }
   0x1   :  { %v35_v0 = vld [vmem:[%s402_s1] sm:$0xff]  ;;  %v36_v1 = vld [vmem:[%s402_s1 + $0x8] sm:$0xff]  ;;  %v37_v2 = vld [vmem:[%s402_s1 + $0x10] sm:$0xff]  ;;  %30 = vst.msk [vmem:[#allocation2 + $0x8] sm:$0xff] %vm28_vm1, %v293_v5 }
   0x2   :  { %v245_v3 = vpack.c.bf16 %v36_v1, %v35_v0  ;;  %v38_v4 = vld [vmem:[%s402_s1 + $0x18] sm:$0xff]  ;;  %29 = vst.msk [vmem:[#allocation2] sm:$0xff] %vm28_vm1, %v293_v5  ;;  %v39_v7 = vld [vmem:[%s402_s1 + $0x20] sm:$0xff]  ;;  %v40_v8 = vld [vmem:[%s402_s1 + $0x28] sm:$0xff] }
   0x3   :  { %v249_v6 = vpack.c.bf16 %v38_v4, %v37_v2  ;;  %v33_v9 = vld [vmem:[%s401_s0] sm:$0xff] }
   0x4   :  { %246 = vmatprep.subr.bf16.mxu0 %v245_v3  ;;  %242 = vmatprep.mubr.msk.f32.mxu0 %vm43_vm0, %v33_v9 }
   0x5   :  { %11 = vsyncpa [#allocation4], 0  ;;  %248 = vmatpush3.bf16.msra.mxu0 %v245_v3  ;;  %v253_v10 = vpack.c.bf16 %v40_v8, %v39_v7  ;;  %v41_v11 = vld [vmem:[%s402_s1 + $0x30] sm:$0xff]  ;;  %v42_v12 = vld [vmem:[%s402_s1 + $0x38] sm:$0xff]  ;;  %s294_s23 = smov [#allocation3]  }
   0x6   :  { %250 = vmatprep.subr.bf16.mxu0 %v249_v6  ;;  %v257_v13 = vpack.c.bf16 %v42_v12, %v41_v11  ;;  %v34_v14 = vld [vmem:[%s401_s0 + $0x8] sm:$0xff]  ;;  %v213_v21 = vld [vmem:[%s403_s2] ss:$0 sm:$0xff]  ;;  %s200_s24 = sshll.u32 %s294_s23, 4  ;;  %s201_s24 = int_to_ptr.vmem [resolvable:$true] %s200_s24 }
   0x7   :  { %v144_v24 = vld [vmem:[%s404_s3] sm:$0xff]  ;;  %v145_v27 = vld [vmem:[%s404_s3 + $0x8] sm:$0xff]  ;;  %s269_s25 = scalar_lea.vmem %s201_s24, 256  ;;  %p274_p1 = scmp.lt.s32.totalorder %s201_s24, %s201_s24 }
   0x8   :  { %v32_v15 = vld [vmem:[#allocation2 + $0x8] sm:$0xff]  ;;  %v214_v49 = vld [vmem:[%s405_s4] ss:$0 sm:$0xff]  ;;  %p270_p0 = scmp.ne.s32.totalorder %s201_s24, %s269_s25  ;;  %p275_p2 = scmp.lt.s32.totalorder %s269_s25, %s269_s25 }
   0x9   :  { %252 = vmatpush3.bf16.msra.mxu0 %v249_v6  ;;  %v31_v16 = vld [vmem:[#allocation2] sm:$0xff] }
   0xa   :  { %254 = vmatprep.subr.bf16.mxu0 %v253_v10  ;;  %v215_v51 = vld [vmem:[%s406_s5] ss:$0 sm:$0xff]  ;;  %p276_p3 = por %p275_p2, %p274_p1 }
   0xc   :  { %p277_p4 = pnand %p276_p3, %p270_p0 }
   0xd   :  { %256 = vmatpush3.bf16.msra.mxu0 %v253_v10 }
   0xe   :  { %258 = vmatprep.subr.bf16.mxu0 %v257_v13 }
  0x11   :  { %260 = vmatpush3.bf16.msra.mxu0 %v257_v13 }
  0x14   :  { %243 = vmatmul.mubr.msk.f32.vlgmr.msra.gmra.mrb[0].mxu0 %vm43_vm0, %v34_v14 }
  0xe7   :  { %v244_v17 = vpop.f32.mrb[0].mxu0 }
  0xe8   :  { %v126_v18 = vadd.f32 %v244_v17, %v32_v15  ;;  %v116_v19 = vpop.f32.mrb[1].mxu0 }
  0xe9   :  { %v125_v20 = vadd.f32 %v116_v19, %v31_v16 }
  0xea   :  { %129 = vst.msk [vmem:[#allocation2 + $0x8] sm:$0xff] %vm28_vm1, %v126_v18 }
  0xeb   :  { %128 = vst.msk [vmem:[#allocation2] sm:$0xff] %vm28_vm1, %v125_v20 }
  0xf1   :  { %v134_v22 = vld [vmem:[#allocation2 + $0x8] sm:$0xff] }
  0xf2   :  { %v133_v23 = vld [vmem:[#allocation2] sm:$0xff]  ;;  %v143_v26 = vadd.f32 %v213_v21, %v134_v22 }
  0xf3   :  { %v142_v25 = vadd.f32 %v213_v21, %v133_v23 }
  0xf4   :  { %v147_v30 = vadd.f32 %v145_v27, %v143_v26 }
  0xf5   :  { %v146_v28 = vadd.f32 %v144_v24, %v142_v25 }
  0xf6   :  { %v151_v31 = vsel %vm28_vm1, %v147_v30, 0.0 }
  0xf7   :  { %v148_v29 = vsel %vm28_vm1, %v146_v28, 0.0 }
  0xf8   :  { %149 = vadd.xlane.f32.xlu0 %v148_v29 }
  0xfc   :  { %152 = vadd.xlane.f32.xlu0 %v151_v31 }
 0x185   :  { %v150_v32 = vpop.xlane.xlu0 %149 }
 0x186   :  { %v155_v33 = vmul.f32 0.03125, %v150_v32 }
 0x188   :  { %v157_v34 = vsub.f32 %v146_v28, %v155_v33 }
 0x189   :  { %v153_v35 = vpop.xlane.xlu0 %152 }
 0x18a   :  { %v156_v36 = vmul.f32 0.03125, %v153_v35  ;;  %v159_v37 = vmul.f32 %v157_v34, %v157_v34 }
 0x18c   :  { %v158_v38 = vsub.f32 %v147_v30, %v156_v36  ;;  %v161_v39 = vsel %vm28_vm1, %v159_v37, 0.0 }
 0x18d   :  { %162 = vadd.xlane.f32.xlu1 %v161_v39 }
 0x18e   :  { %v160_v40 = vmul.f32 %v158_v38, %v158_v38 }
 0x190   :  { %v164_v41 = vsel %vm28_vm1, %v160_v40, 0.0 }
 0x191   :  { %165 = vadd.xlane.f32.xlu1 %v164_v41 }
 0x21a   :  { %v163_v42 = vpop.xlane.xlu1 %162 }
 0x21b   :  { %v167_v43 = vmul.f32 0.03125, %v163_v42 }
 0x21d   :  { %v169_v44 = vadd.f32 1e-12, %v167_v43 }
 0x21e   :  { %v166_v45 = vpop.xlane.xlu1 %165 }
 0x21f   :  { %265 = vrsqrt.f32 %v169_v44  ;;  %v168_v46 = vmul.f32 0.03125, %v166_v45 }
 0x221   :  { %v170_v47 = vadd.f32 1e-12, %v168_v46 }
 0x223   :  { %267 = vrsqrt.f32 %v170_v47 }
 0x229   :  { %v266_v48 = vpop.eup %265 }
 0x22a   :  { %v173_v50 = vmul.f32 %v266_v48, %v157_v34 }
 0x22c   :  { %v182_v52 = vmul.f32 %v214_v49, %v173_v50 }
 0x22d   :  { %v268_v53 = vpop.eup %267 }
 0x22e   :  { %v174_v54 = vmul.f32 %v268_v53, %v158_v38  ;;  %v191_v55 = vadd.f32 %v215_v51, %v182_v52 }
 0x230   :  { %v183_v56 = vmul.f32 %v214_v49, %v174_v54  ;;  %193 = vst.msk [vmem:[#allocation3] sm:$0xff] %vm28_vm1, %v191_v55 }
 0x232   :  { %v192_v57 = vadd.f32 %v215_v51, %v183_v56 }
 0x234   :  { %194 = vst.msk [vmem:[#allocation3 + $0x8] sm:$0xff] %vm28_vm1, %v192_v57 }
 0x235   :  { %280 = shalt.err (!%p277_p4)
}
 0x236   :  { %s281_s26 = scalar_lea.hbm %s407_s6, 256 }
 0x237   :  { %p282_p5 = scmp.ne.s32.totalorder %s407_s6, %s281_s26  ;;  %p285_p6 = scmp.lt.u32.totalorder %s281_s26, %s407_s6 }
 0x239   :  { %p287_p7 = pnand %p285_p6, %p282_p5 }
 0x23b   :  { %290 = shalt.err (!%p287_p7)
}
 0x23c   :  { %s295_s7 = smov 128   ;;  %s296_s8 = smov 8  }
 0x23d   :  { %206 = dma.vmem_to_hbm [thread:$0]  %s201_s24, 256, %s407_s6, [#allocation4], %s295_s7, %s295_s7, %s296_s8  }
 0x23e   :  { %291 = dma.done.wait [#allocation4], 256  }
 0x23f   :  { %292 = vsyncadd [#allocation4], 4294967040 }
 0x240   :  { %210 = vsyncpa [#allocation4], 1 }

</bundles_post_ra>
